<compile_context>
chip_gen: v7x
topology: tpu7x:2x2x1
jax: 0.10.0
libtpu: 0.0.40
codegen_flags: <defaults>
</compile_context>

<pallas_src>
import functools

import jax
import jax.numpy as jnp
from jax import lax
from jax.experimental import pallas as pl
from jax.experimental.pallas import tpu as pltpu

EPS = 1e-5
LANE = 128
HALO = 8          # sublane-aligned halo; the tap windows only ever reach 1 row into it


def _round_up(v, m):
    return (v + m - 1) // m * m


def _bottleneck_ci_kernel(last_relu, x_ref, w1_ref, w2_ref, w3_ref,
                          b1_ref, b2_ref, b3_ref, o_ref, h1_buf):
    # x_ref : (H, W, Cp)           bf16 input tile (one image; batch squeezed)
    # w1_ref: (Cp, Pp)             1x1 conv weight, BN1 scale folded in, bf16
    # w2_ref: (9*Pp, Pp)           3x3 conv weight, tap-major rows, BN2 folded, bf16
    # w3_ref: (Pp, Cp)             1x1 conv weight, BN3 folded, bf16
    # b*_ref: (1, C)               folded BN biases, f32
    # o_ref : (H-2, W-2, Cp)       center-cropped output, f32
    # h1_buf: (H*W + 2*HALO, Pp)   f32 scratch: flat conv1 output with halo rows
    H, W, Cp = x_ref.shape
    Pp = w1_ref.shape[1]
    HI, WI = H - 2, W - 2
    HW = H * W
    NI = HI * W                                 # interior rows kept after the row crop
    halo = (h1_buf.shape[0] - HW) // 2

    # ---- conv1 (1x1) + bias + relu (f32 accumulation on the MXU) ------------
    # Computed for ALL rows: conv2 needs the vertical neighbours.
    xf = x_ref[...].reshape(HW, Cp)                            # (HW, Cp) bf16
    h1 = jnp.dot(xf, w1_ref[...], preferred_element_type=jnp.float32)
    h1 = jnp.maximum(h1 + b1_ref[...], 0.0)                    # (HW, Pp) f32

    # ---- stage h1 once into the flat halo slab (sublane-aligned write) ------
    h1_buf[:halo, :] = jnp.zeros((halo, Pp), jnp.float32)
    h1_buf[halo + HW:, :] = jnp.zeros((halo, Pp), jnp.float32)
    h1_buf[halo:halo + HW, :] = h1

    # ---- conv2 (3x3, padding=1) as ONE fused K=9*Pp matmul ------------------
    # Tap (ky,kx) of the 3x3 is a row-shifted window of the same slab.  The
    # window is shifted by +W so only the HI interior output rows are computed;
    # halo / row-wrap contributions only reach the left/right border columns,
    # which the final center crop discards.
    base = halo + W                                            # pixel (y=1, x=0)
    taps = []
    for t in range(9):                                         # static unroll
        ky, kx = t // 3, t % 3
        d = (ky - 1) * W + (kx - 1)                            # flat tap offset
        start = base + d
        taps.append(h1_buf[start:start + NI, :].astype(jnp.bfloat16))
    xcat = jnp.concatenate(taps, axis=1)                       # (NI, 9*Pp), lane concat
    h2 = jnp.dot(xcat, w2_ref[...], preferred_element_type=jnp.float32)
    h2 = jnp.maximum(h2 + b2_ref[...], 0.0)                    # (NI, Pp) f32

    # ---- conv3 (1x1) + bias + residual (+ last relu) ------------------------
    res = x_ref[1:H - 1].reshape(NI, Cp).astype(jnp.float32)
    out = jnp.dot(h2.astype(jnp.bfloat16), w3_ref[...],
                  preferred_element_type=jnp.float32)
    out = out + b3_ref[...] + res
    if last_relu:
        out = jnp.maximum(out, 0.0)

    # Left/right column crop at the final (full-block, lane-dense) store.
    o_ref[...] = out.reshape(HI, W, Cp)[:, 1:W - 1, :]


def bottleneck_ci(x, folded_params, last_relu=True):
    """x: (N, H, W, Cin) float32, NHWC.  Returns (N, H-2, W-2, Cin) float32."""
    w1, w2, w3, b1, b2, b3 = folded_params
    N, H, W, Cin = x.shape
    P = w1.shape[1]
    assert Cin == 4 * P, "downsample=None path requires inplanes == planes * 4"
    assert w2.shape == (3, 3, P, P)

    Pp, Cp = _round_up(P, LANE), _round_up(Cin, LANE)
    HI, WI = H - 2, W - 2

    # Lane-dense zero padding + bf16 cast (cheap wrapper-side XLA ops).
    xp = jnp.pad(x, ((0, 0),) * 3 + ((0, Cp - Cin),)).astype(jnp.bfloat16)
    w1p = jnp.pad(w1, ((0, Cp - Cin), (0, Pp - P))).astype(jnp.bfloat16)
    w2p = jnp.pad(w2, ((0, 0), (0, 0), (0, Pp - P), (0, Pp - P)))
    w2p = w2p.reshape(9 * Pp, Pp).astype(jnp.bfloat16)          # tap-major rows
    w3p = jnp.pad(w3, ((0, Pp - P), (0, Cp - Cin))).astype(jnp.bfloat16)
    b1p = jnp.pad(b1, (0, Pp - P)).reshape(1, Pp).astype(jnp.float32)
    b2p = jnp.pad(b2, (0, Pp - P)).reshape(1, Pp).astype(jnp.float32)
    b3p = jnp.pad(b3, (0, Cp - Cin)).reshape(1, Cp).astype(jnp.float32)

    kernel = functools.partial(_bottleneck_ci_kernel, last_relu)

    out = pl.pallas_call(
        kernel,
        grid=(N,),
        out_shape=jax.ShapeDtypeStruct((N, HI, WI, Cp), jnp.float32),
        in_specs=[
            pl.BlockSpec((None, H, W, Cp), lambda n: (n, 0, 0, 0)),   # x (per image)
            pl.BlockSpec((Cp, Pp), lambda n: (0, 0)),                 # w1 (resident)
            pl.BlockSpec((9 * Pp, Pp), lambda n: (0, 0)),             # w2 (resident)
            pl.BlockSpec((Pp, Cp), lambda n: (0, 0)),                 # w3 (resident)
            pl.BlockSpec((1, Pp), lambda n: (0, 0)),                  # b1
            pl.BlockSpec((1, Pp), lambda n: (0, 0)),                  # b2
            pl.BlockSpec((1, Cp), lambda n: (0, 0)),                  # b3
        ],
        out_specs=pl.BlockSpec((None, HI, WI, Cp), lambda n: (n, 0, 0, 0)),
        scratch_shapes=[pltpu.VMEM((H * W + 2 * HALO, Pp), jnp.float32)],
        compiler_params=pltpu.CompilerParams(
            dimension_semantics=("parallel",),          # megacore on v7x
            # generation-aware: fits v7x's 64 MiB VMEM with headroom; well under
            # the 128 MiB of v5e/v6e.
            vmem_limit_bytes=48 * 1024 * 1024,
        ),
    )(xp, w1p, w2p, w3p, b1p, b2p, b3p)

    return out[..., :Cin]                 # drop the lane padding


# --------------------------- parameter construction ---------------------------

def _fold_bn(w, gamma, beta, mean, var):
    """Fold eval-mode BatchNorm into the conv weight (output channel = last axis)."""
    scale = gamma / jnp.sqrt(var + EPS)
    bias = beta - mean * scale
    return w * scale, bias


def _make_params(key, inplanes, planes):
    ks = jax.random.split(key, 6)
    cout = 4 * planes
    w1 = jax.random.normal(ks[0], (inplanes, planes), jnp.float32) * 0.1     # 1x1
    w2 = jax.random.normal(ks[1], (3, 3, planes, planes), jnp.float32) * 0.1  # HWIO
    w3 = jax.random.normal(ks[2], (planes, cout), jnp.float32) * 0.1         # 1x1

    def bn(k, c):
        kg, kb, km, kv = jax.random.split(k, 4)
        gamma = 1.0 + 0.1 * jax.random.normal(kg, (c,), jnp.float32)
        beta = 0.1 * jax.random.normal(kb, (c,), jnp.float32)
        mean = 0.1 * jax.random.normal(km, (c,), jnp.float32)
        var = jnp.abs(jax.random.normal(kv, (c,), jnp.float32)) + 0.5
        return gamma, beta, mean, var

    w1f, b1 = _fold_bn(w1, *bn(ks[3], planes))
    w2f, b2 = _fold_bn(w2, *bn(ks[4], planes))
    w3f, b3 = _fold_bn(w3, *bn(ks[5], cout))
    return (w1f, w2f, w3f, b1, b2, b3)


# --------------------------------- reference ----------------------------------

def _reference(x, folded_params, last_relu=True):
    """Pure-JAX NHWC reference (eval BN folded), matching the kernel's bf16
    rounding points so the comparison isolates real bugs."""
    w1, w2, w3, b1, b2, b3 = folded_params
    bf = lambda a: a.astype(jnp.bfloat16).astype(jnp.float32)
    dn = ('NHWC', 'HWIO', 'NHWC')
    hp = lax.Precision.HIGHEST
    xr = bf(x)
    h = lax.conv_general_dilated(xr, bf(w1).reshape(1, 1, *w1.shape), (1, 1),
                                 'VALID', dimension_numbers=dn, precision=hp)
    h = jnp.maximum(h + b1.reshape(1, 1, 1, -1), 0.0)
    h = lax.conv_general_dilated(bf(h), bf(w2), (1, 1), ((1, 1), (1, 1)),
                                 dimension_numbers=dn, precision=hp)
    h = jnp.maximum(h + b2.reshape(1, 1, 1, -1), 0.0)
    h = lax.conv_general_dilated(bf(h), bf(w3).reshape(1, 1, *w3.shape), (1, 1),
                                 'VALID', dimension_numbers=dn, precision=hp)
    out = h + b3.reshape(1, 1, 1, -1) + xr
    if last_relu:
        out = jnp.maximum(out, 0.0)
    return out[:, 1:-1, 1:-1, :]


if __name__ == "__main__":
    key = jax.random.PRNGKey(0)
    kx, kp = jax.random.split(key)

    planes = 8
    inplanes = 4 * planes          # 32: residual add works (downsample=None)
    N, H, W = 2, 16, 16

    # PyTorch input would be NCHW (2, 32, 16, 16); the kernel consumes NHWC.
    x = jax.random.normal(kx, (N, H, W, inplanes), jnp.float32)
    params = _make_params(kp, inplanes, planes)

    out = jax.block_until_ready(bottleneck_ci(x, params, last_relu=True))
    ref = _reference(x, params, last_relu=True)

    assert out.shape == (N, H - 2, W - 2, inplanes), out.shape
    max_err = float(jnp.max(jnp.abs(out - ref)))
    assert jnp.allclose(out, ref, rtol=5e-3, atol=5e-3), max_err

    print("KERNEL_OK")
</pallas_src>

<mosaic_0001>
module attributes {stable_mosaic.version = 11 : i64} {
  func.func @_bottleneck_ci_kernel(%arg0: i32, %arg1: memref<1x16x16x128xbf16, #tpu.memory_space<vmem>>, %arg2: memref<128x128xbf16, #tpu.memory_space<vmem>>, %arg3: memref<1152x128xbf16, #tpu.memory_space<vmem>>, %arg4: memref<128x128xbf16, #tpu.memory_space<vmem>>, %arg5: memref<1x128xf32, #tpu.memory_space<vmem>>, %arg6: memref<1x128xf32, #tpu.memory_space<vmem>>, %arg7: memref<1x128xf32, #tpu.memory_space<vmem>>, %arg8: memref<1x14x14x128xf32, #tpu.memory_space<vmem>>, %arg9: memref<272x128xf32, #tpu.memory_space<vmem>>) attributes {dimension_semantics = [#tpu.dimension_semantics<parallel>], iteration_bounds = array<i64: 2>, scalar_prefetch = 0 : i64, scratch_operands = 1 : i64, tpu.core_type = #tpu.core_type<tc>, window_params = [{transform_indices = @transform_0, window_bounds = array<i64: 1, 16, 16, 128>}, {pipeline_mode = #tpu.pipeline_mode<synchronous>, transform_indices = @transform_1, window_bounds = array<i64: 128, 128>}, {pipeline_mode = #tpu.pipeline_mode<synchronous>, transform_indices = @transform_2, window_bounds = array<i64: 1152, 128>}, {pipeline_mode = #tpu.pipeline_mode<synchronous>, transform_indices = @transform_3, window_bounds = array<i64: 128, 128>}, {pipeline_mode = #tpu.pipeline_mode<synchronous>, transform_indices = @transform_4, window_bounds = array<i64: 1, 128>}, {pipeline_mode = #tpu.pipeline_mode<synchronous>, transform_indices = @transform_5, window_bounds = array<i64: 1, 128>}, {pipeline_mode = #tpu.pipeline_mode<synchronous>, transform_indices = @transform_6, window_bounds = array<i64: 1, 128>}, {transform_indices = @transform_7, window_bounds = array<i64: 1, 14, 14, 128>}]} {
    %c0 = arith.constant 0 : index
    %c0_0 = arith.constant 0 : index
    %c0_1 = arith.constant 0 : index
    %c0_2 = arith.constant 0 : index
    %0 = vector.load %arg1[%c0, %c0_0, %c0_1, %c0_2] : memref<1x16x16x128xbf16, #tpu.memory_space<vmem>>, vector<1x16x16x128xbf16>
    %1 = vector.shape_cast %0 : vector<1x16x16x128xbf16> to vector<16x16x128xbf16>
    %2 = vector.shape_cast %1 : vector<16x16x128xbf16> to vector<256x128xbf16>
    %c0_3 = arith.constant 0 : index
    %c0_4 = arith.constant 0 : index
    %3 = vector.load %arg2[%c0_3, %c0_4] : memref<128x128xbf16, #tpu.memory_space<vmem>>, vector<128x128xbf16>
    %cst = arith.constant dense<0.000000e+00> : vector<256x128xf32>
    %4 = tpu.matmul %2, %3, %cst {dimension_numbers = #tpu.dot_dimension_numbers<[1], [0], [0], [1], [0, 0, 1, 1], [], []>} : vector<256x128xbf16>, vector<128x128xbf16>, vector<256x128xf32> -> vector<256x128xf32>
    %c0_5 = arith.constant 0 : index
    %c0_6 = arith.constant 0 : index
    %5 = vector.load %arg5[%c0_5, %c0_6] : memref<1x128xf32, #tpu.memory_space<vmem>>, vector<1x128xf32>
    %6 = vector.broadcast %5 : vector<1x128xf32> to vector<256x128xf32>
    %7 = arith.addf %4, %6 : vector<256x128xf32>
    %cst_7 = arith.constant 0.000000e+00 : f32
    %8 = vector.broadcast %cst_7 : f32 to vector<256x128xf32>
    %9 = arith.maximumf %7, %8 : vector<256x128xf32>
    %cst_8 = arith.constant 0.000000e+00 : f32
    %10 = vector.broadcast %cst_8 : f32 to vector<8x128xf32>
    %c0_9 = arith.constant 0 : index
    %c0_10 = arith.constant 0 : index
    %11 = vector.load %arg9[%c0_9, %c0_10] : memref<272x128xf32, #tpu.memory_space<vmem>>, vector<8x128xf32>
    tpu.vector_store %arg9[%c0_9, %c0_10], %10 {strides = array<i32>} : memref<272x128xf32, #tpu.memory_space<vmem>>, vector<8x128xf32>,
    %cst_11 = arith.constant 0.000000e+00 : f32
    %12 = vector.broadcast %cst_11 : f32 to vector<8x128xf32>
    %c264 = arith.constant 264 : index
    %c0_12 = arith.constant 0 : index
    %13 = vector.load %arg9[%c264, %c0_12] : memref<272x128xf32, #tpu.memory_space<vmem>>, vector<8x128xf32>
    tpu.vector_store %arg9[%c264, %c0_12], %12 {strides = array<i32>} : memref<272x128xf32, #tpu.memory_space<vmem>>, vector<8x128xf32>,
    %c8 = arith.constant 8 : index
    %c0_13 = arith.constant 0 : index
    %14 = vector.load %arg9[%c8, %c0_13] : memref<272x128xf32, #tpu.memory_space<vmem>>, vector<256x128xf32>
    tpu.vector_store %arg9[%c8, %c0_13], %9 {strides = array<i32>} : memref<272x128xf32, #tpu.memory_space<vmem>>, vector<256x128xf32>,
    %c7 = arith.constant 7 : index
    %c0_14 = arith.constant 0 : index
    %15 = vector.load %arg9[%c7, %c0_14] : memref<272x128xf32, #tpu.memory_space<vmem>>, vector<224x128xf32>
    %16 = arith.truncf %15 : vector<224x128xf32> to vector<224x128xbf16>
    %c8_15 = arith.constant 8 : index
    %c0_16 = arith.constant 0 : index
    %17 = vector.load %arg9[%c8_15, %c0_16] : memref<272x128xf32, #tpu.memory_space<vmem>>, vector<224x128xf32>
    %18 = arith.truncf %17 : vector<224x128xf32> to vector<224x128xbf16>
    %c9 = arith.constant 9 : index
    %c0_17 = arith.constant 0 : index
    %19 = vector.load %arg9[%c9, %c0_17] : memref<272x128xf32, #tpu.memory_space<vmem>>, vector<224x128xf32>
    %20 = arith.truncf %19 : vector<224x128xf32> to vector<224x128xbf16>
    %c23 = arith.constant 23 : index
    %c0_18 = arith.constant 0 : index
    %21 = vector.load %arg9[%c23, %c0_18] : memref<272x128xf32, #tpu.memory_space<vmem>>, vector<224x128xf32>
    %22 = arith.truncf %21 : vector<224x128xf32> to vector<224x128xbf16>
    %c24 = arith.constant 24 : index
    %c0_19 = arith.constant 0 : index
    %23 = vector.load %arg9[%c24, %c0_19] : memref<272x128xf32, #tpu.memory_space<vmem>>, vector<224x128xf32>
    %24 = arith.truncf %23 : vector<224x128xf32> to vector<224x128xbf16>
    %c25 = arith.constant 25 : index
    %c0_20 = arith.constant 0 : index
    %25 = vector.load %arg9[%c25, %c0_20] : memref<272x128xf32, #tpu.memory_space<vmem>>, vector<224x128xf32>
    %26 = arith.truncf %25 : vector<224x128xf32> to vector<224x128xbf16>
    %c39 = arith.constant 39 : index
    %c0_21 = arith.constant 0 : index
    %27 = vector.load %arg9[%c39, %c0_21] : memref<272x128xf32, #tpu.memory_space<vmem>>, vector<224x128xf32>
    %28 = arith.truncf %27 : vector<224x128xf32> to vector<224x128xbf16>
    %c40 = arith.constant 40 : index
    %c0_22 = arith.constant 0 : index
    %29 = vector.load %arg9[%c40, %c0_22] : memref<272x128xf32, #tpu.memory_space<vmem>>, vector<224x128xf32>
    %30 = arith.truncf %29 : vector<224x128xf32> to vector<224x128xbf16>
    %c41 = arith.constant 41 : index
    %c0_23 = arith.constant 0 : index
    %31 = vector.load %arg9[%c41, %c0_23] : memref<272x128xf32, #tpu.memory_space<vmem>>, vector<224x128xf32>
    %32 = arith.truncf %31 : vector<224x128xf32> to vector<224x128xbf16>
    %33 = tpu.concatenate %16, %18, %20, %22, %24, %26, %28, %30, %32 in 1 : vector<224x128xbf16>, vector<224x128xbf16>, vector<224x128xbf16>, vector<224x128xbf16>, vector<224x128xbf16>, vector<224x128xbf16>, vector<224x128xbf16>, vector<224x128xbf16>, vector<224x128xbf16> -> vector<224x1152xbf16>
    %c0_24 = arith.constant 0 : index
    %c0_25 = arith.constant 0 : index
    %34 = vector.load %arg3[%c0_24, %c0_25] : memref<1152x128xbf16, #tpu.memory_space<vmem>>, vector<1152x128xbf16>
    %cst_26 = arith.constant dense<0.000000e+00> : vector<224x128xf32>
    %35 = tpu.matmul %33, %34, %cst_26 {dimension_numbers = #tpu.dot_dimension_numbers<[1], [0], [0], [1], [0, 0, 1, 1], [], []>} : vector<224x1152xbf16>, vector<1152x128xbf16>, vector<224x128xf32> -> vector<224x128xf32>
    %c0_27 = arith.constant 0 : index
    %c0_28 = arith.constant 0 : index
    %36 = vector.load %arg6[%c0_27, %c0_28] : memref<1x128xf32, #tpu.memory_space<vmem>>, vector<1x128xf32>
    %37 = vector.broadcast %36 : vector<1x128xf32> to vector<224x128xf32>
    %38 = arith.addf %35, %37 : vector<224x128xf32>
    %cst_29 = arith.constant 0.000000e+00 : f32
    %39 = vector.broadcast %cst_29 : f32 to vector<224x128xf32>
    %40 = arith.maximumf %38, %39 : vector<224x128xf32>
    %c0_30 = arith.constant 0 : index
    %c1 = arith.constant 1 : index
    %c0_31 = arith.constant 0 : index
    %c0_32 = arith.constant 0 : index
    %41 = vector.load %arg1[%c0_30, %c1, %c0_31, %c0_32] : memref<1x16x16x128xbf16, #tpu.memory_space<vmem>>, vector<1x14x16x128xbf16>
    %42 = vector.shape_cast %41 : vector<1x14x16x128xbf16> to vector<14x16x128xbf16>
    %43 = vector.shape_cast %42 : vector<14x16x128xbf16> to vector<224x128xbf16>
    %44 = arith.extf %43 : vector<224x128xbf16> to vector<224x128xf32>
    %45 = arith.truncf %40 : vector<224x128xf32> to vector<224x128xbf16>
    %c0_33 = arith.constant 0 : index
    %c0_34 = arith.constant 0 : index
    %46 = vector.load %arg4[%c0_33, %c0_34] : memref<128x128xbf16, #tpu.memory_space<vmem>>, vector<128x128xbf16>
    %cst_35 = arith.constant dense<0.000000e+00> : vector<224x128xf32>
    %47 = tpu.matmul %45, %46, %cst_35 {dimension_numbers = #tpu.dot_dimension_numbers<[1], [0], [0], [1], [0, 0, 1, 1], [], []>} : vector<224x128xbf16>, vector<128x128xbf16>, vector<224x128xf32> -> vector<224x128xf32>
    %c0_36 = arith.constant 0 : index
    %c0_37 = arith.constant 0 : index
    %48 = vector.load %arg7[%c0_36, %c0_37] : memref<1x128xf32, #tpu.memory_space<vmem>>, vector<1x128xf32>
    %49 = vector.broadcast %48 : vector<1x128xf32> to vector<224x128xf32>
    %50 = arith.addf %47, %49 : vector<224x128xf32>
    %51 = arith.addf %50, %44 : vector<224x128xf32>
    %cst_38 = arith.constant 0.000000e+00 : f32
    %52 = vector.broadcast %cst_38 : f32 to vector<224x128xf32>
    %53 = arith.maximumf %51, %52 : vector<224x128xf32>
    %54 = vector.shape_cast %53 : vector<224x128xf32> to vector<14x16x128xf32>
    %55 = vector.extract_strided_slice %54 {offsets = [0, 1, 0], sizes = [14, 14, 128], strides = [1, 1, 1]} : vector<14x16x128xf32> to vector<14x14x128xf32>
    %c0_39 = arith.constant 0 : index
    %c0_40 = arith.constant 0 : index
    %c0_41 = arith.constant 0 : index
    %c0_42 = arith.constant 0 : index
    %56 = vector.load %arg8[%c0_39, %c0_40, %c0_41, %c0_42] : memref<1x14x14x128xf32, #tpu.memory_space<vmem>>, vector<1x14x14x128xf32>
    %57 = vector.shape_cast %56 : vector<1x14x14x128xf32> to vector<14x14x128xf32>
    %58 = vector.shape_cast %55 : vector<14x14x128xf32> to vector<1x14x14x128xf32>
    tpu.vector_store %arg8[%c0_39, %c0_40, %c0_41, %c0_42], %58 {strides = array<i32>} : memref<1x14x14x128xf32, #tpu.memory_space<vmem>>, vector<1x14x14x128xf32>,
    return
  }
  func.func @transform_0(%arg0: i32) -> (i32, i32, i32, i32) {
    %c0_i32 = arith.constant 0 : i32
    %c0_i32_0 = arith.constant 0 : i32
    %c0_i32_1 = arith.constant 0 : i32
    %c0_i32_2 = arith.constant 0 : i32
    return %arg0, %c0_i32, %c0_i32_0, %c0_i32_1 : i32, i32, i32, i32
  }
  func.func @transform_1(%arg0: i32) -> (i32, i32) {
    %c0_i32 = arith.constant 0 : i32
    %c0_i32_0 = arith.constant 0 : i32
    %c0_i32_1 = arith.constant 0 : i32
    return %c0_i32, %c0_i32_0 : i32, i32
  }
  func.func @transform_2(%arg0: i32) -> (i32, i32) {
    %c0_i32 = arith.constant 0 : i32
    %c0_i32_0 = arith.constant 0 : i32
    %c0_i32_1 = arith.constant 0 : i32
    return %c0_i32, %c0_i32_0 : i32, i32
  }
  func.func @transform_3(%arg0: i32) -> (i32, i32) {
    %c0_i32 = arith.constant 0 : i32
    %c0_i32_0 = arith.constant 0 : i32
    %c0_i32_1 = arith.constant 0 : i32
    return %c0_i32, %c0_i32_0 : i32, i32
  }
  func.func @transform_4(%arg0: i32) -> (i32, i32) {
    %c0_i32 = arith.constant 0 : i32
    %c0_i32_0 = arith.constant 0 : i32
    %c0_i32_1 = arith.constant 0 : i32
    return %c0_i32, %c0_i32_0 : i32, i32
  }
  func.func @transform_5(%arg0: i32) -> (i32, i32) {
    %c0_i32 = arith.constant 0 : i32
    %c0_i32_0 = arith.constant 0 : i32
    %c0_i32_1 = arith.constant 0 : i32
    return %c0_i32, %c0_i32_0 : i32, i32
  }
  func.func @transform_6(%arg0: i32) -> (i32, i32) {
    %c0_i32 = arith.constant 0 : i32
    %c0_i32_0 = arith.constant 0 : i32
    %c0_i32_1 = arith.constant 0 : i32
    return %c0_i32, %c0_i32_0 : i32, i32
  }
  func.func @transform_7(%arg0: i32) -> (i32, i32, i32, i32) {
    %c0_i32 = arith.constant 0 : i32
    %c0_i32_0 = arith.constant 0 : i32
    %c0_i32_1 = arith.constant 0 : i32
    %c0_i32_2 = arith.constant 0 : i32
    return %arg0, %c0_i32, %c0_i32_0, %c0_i32_1 : i32, i32, i32, i32
  }
}

</mosaic_0001>

<bundles_post_ra>
// kernel: tpu_custom_call.1
= control target key start
LH: loop header
LB: loop body
LE: loop exit
PB: predicated region body
PF: predicated region fallthrough
CT: control target
= control target key end

     0   :  { %12 = vsyncpa [#allocation4], 0  ;;  %s4710_s0 = inlined_call_operand.hbm [shape: bf16[2,16,16,128], index: 0, kind: input, shape index: {}]   ;;  %s4711_s1 = inlined_call_operand.hbm [shape: bf16[128,128], index: 1, kind: input, shape index: {}]   ;;  %s4712_s2 = inlined_call_operand.hbm [shape: bf16[1152,128], index: 2, kind: input, shape index: {}]   ;;  %s4713_s3 = inlined_call_operand.hbm [shape: bf16[128,128], index: 3, kind: input, shape index: {}]   ;;  %s4714_s4 = inlined_call_operand.vmem [shape: f32[1,128], index: 4, kind: input, shape index: {}]   ;;  %s4715_s5 = inlined_call_operand.vmem [shape: f32[1,128], index: 5, kind: input, shape index: {}]   ;;  %s4716_s6 = inlined_call_operand.vmem [shape: f32[1,128], index: 6, kind: input, shape index: {}]   ;;  %s4717_s7 = inlined_call_operand.vmem [shape: f32[2,14,14,128], index: 7, kind: output, shape index: {}]  }
   0x1   :  { %14 = vsyncpa [#allocation4 + $0x1], 0 }
   0x2   :  { %15 = vsyncpa [#allocation6], 0 }
   0x3   :  { %16 = vsyncpa [#allocation9], 0  ;;  %s3943_s24 = smov 0   ;;  %s3945_s25 = smov 0  }
   0x4   :  { %s3947_s26 = smov 0   ;;  %s3949_s27 = smov 0  }
   0x5 LB: > { %s3962_s28 = sadd.s32 4294967295, %s3894_s27   ;;  %p42_p0 = scmp.ne.s32.totalorder %s3886_s25, %s3882_s24  ;;  %s3894_s27 = sphi %s3949_s27, %s4735_s27   ;;  %s3890_s26 = sphi %s3947_s26, %s4734_s26   ;;  %s3886_s25 = sphi %s3945_s25, %s4733_s25   ;;  %s3882_s24 = sphi %s3943_s24, %s4732_s24  }
   0x6   : > { %p4718_p1 = scmp.eq.s32.totalorder %s3962_s28, 0  ;;  %p2718_p2 = scmp.ge.s32.totalorder %s3894_s27, 1 }
   0x7   : > { %p205_p3 = scmp.lt.s32.totalorder %s3894_s27, 3  ;;  %s3896_s8 = smov [#allocation5]  }
   0x8   : > { %p3970_p4 = por %p4718_p1, %p42_p0  ;;  %s217_s9 = sshll.u32 %s3896_s8, 4  ;;  %s3978_s9 = int_to_ptr.vmem [resolvable:$true] %s217_s9 }
   0x9   : > { %p3974_p5 = pnand %p2718_p2, %p205_p3  ;;  %s3897_s11 = smov [#allocation7]  }
   0xa   : > { %s4721_s29 = scalar_select %p3970_p4, 1, 0 }
   0xb   : > { %s4722_s30 = scalar_select %p3974_p5, 1, 0 }
   0xc   : > { %p3575_p6 = pneg %p3974_p5  ;;  %s230_s12 = sshll.u32 %s3897_s11, 4  ;;  %s3988_s12 = int_to_ptr.vmem [resolvable:$true] %s230_s12 }
   0xd   : > { %s3898_s13 = smov [#allocation8]   ;;  %s3738_s17 = scalar_lea.hbm %s4711_s1, 1024 }
   0xe   : > { %p3984_p7 = pnand %p3575_p6, %p4718_p1  ;;  %s3990_s14 = sshll.u32 %s3898_s13, 4  ;;  %s244_s14 = int_to_ptr.vmem [resolvable:$true] %s3990_s14 }
   0xf   : > { %p3739_p8 = scmp.ne.s32.totalorder %s4711_s1, %s3738_s17  ;;  %p3745_p12 = scmp.lt.u32.totalorder %s3738_s17, %s4711_s1 }
  0x10   : > { %p4000_p9 = pneg %p3984_p7 }
  0x12   : > { %p3741_p10 = pnand %p4000_p9, %p3739_p8 }
  0x14   : > { %p3742_p11 = pneg %p3741_p10 }
  0x16   : > { %p3747_p13 = pnand %p3745_p12, %p3742_p11 }
  0x18   : > { %3750 = shalt.err (!%p3747_p13)
}
  0x19   : > { %s3751_s23 = scalar_lea.vmem %s3978_s9, 1024  ;;  %p3759_p6 = scmp.lt.s32.totalorder %s3978_s9, %s3978_s9 }
  0x1a   : > { %p3752_p0 = scmp.ne.s32.totalorder %s3978_s9, %s3751_s23  ;;  %p3760_p1 = scmp.lt.s32.totalorder %s3751_s23, %s3751_s23 }
  0x1c   : > { %p3754_p2 = pnand %p3752_p0, %p4000_p9  ;;  %p3761_p8 = por %p3760_p1, %p3759_p6 }
  0x1e   : > { %p3755_p3 = pneg %p3754_p2 }
  0x20   : > { %p3762_p10 = pnand %p3761_p8, %p3755_p3 }
  0x22   : > { %3765 = shalt.err (!%p3762_p10)
}
  0x23   : > { %s3899_s24 = smov 64   ;;  %s3900_s8 = smov 4  }
  0x24   : > { %3578 = dma.hbm_to_vmem [thread:$0]  (!%p3984_p7), %s4711_s1, 1024, %s3978_s9, [#allocation6], %s3899_s24, %s3899_s24, %s3900_s8  }
  0x25   : > { %s3766_s17 = scalar_lea.hbm %s4712_s2, 9216 }
  0x26   : > { %p3767_p1 = scmp.ne.s32.totalorder %s4712_s2, %s3766_s17  ;;  %p3773_p13 = scmp.lt.u32.totalorder %s3766_s17, %s4712_s2 }
  0x28   : > { %p3769_p11 = pnand %p3767_p1, %p4000_p9 }
  0x2a   : > { %p3770_p12 = pneg %p3769_p11 }
  0x2c   : > { %p3775_p0 = pnand %p3773_p13, %p3770_p12 }
  0x2e   : > { %3778 = shalt.err (!%p3775_p0)
}
  0x2f   : > { %s3779_s9 = scalar_lea.vmem %s3988_s12, 9216  ;;  %p3787_p8 = scmp.lt.s32.totalorder %s3988_s12, %s3988_s12 }
  0x30   : > { %p3780_p2 = scmp.ne.s32.totalorder %s3988_s12, %s3779_s9  ;;  %p3788_p10 = scmp.lt.s32.totalorder %s3779_s9, %s3779_s9 }
  0x32   : > { %p3782_p3 = pnand %p3780_p2, %p4000_p9  ;;  %p3789_p1 = por %p3788_p10, %p3787_p8 }
  0x34   : > { %p3783_p6 = pneg %p3782_p3 }
  0x36   : > { %p3790_p11 = pnand %p3789_p1, %p3783_p6 }
  0x38   : > { %3793 = shalt.err (!%p3790_p11)
}
  0x39   : > { %3581 = dma.hbm_to_vmem [thread:$0]  (!%p3984_p7), %s4712_s2, 9216, %s3988_s12, [#allocation6], %s3899_s24, %s3899_s24, %s3900_s8  }
  0x3a   : > { %s3794_s16 = scalar_lea.hbm %s4713_s3, 1024 }
  0x3b   : > { %p3795_p12 = scmp.ne.s32.totalorder %s4713_s3, %s3794_s16  ;;  %p3801_p2 = scmp.lt.u32.totalorder %s3794_s16, %s4713_s3 }
  0x3d   : > { %p3797_p13 = pnand %p3795_p12, %p4000_p9 }
  0x3f   : > { %p3798_p0 = pneg %p3797_p13 }
  0x41   : > { %p3803_p3 = pnand %p3801_p2, %p3798_p0 }
  0x43   : > { %3806 = shalt.err (!%p3803_p3)
}
  0x44   : > { %s3807_s22 = scalar_lea.vmem %s244_s14, 1024  ;;  %p3815_p1 = scmp.lt.s32.totalorder %s244_s14, %s244_s14 }
  0x45   : > { %p3808_p6 = scmp.ne.s32.totalorder %s244_s14, %s3807_s22  ;;  %p3816_p11 = scmp.lt.s32.totalorder %s3807_s22, %s3807_s22 }
  0x47   : > { %p3810_p8 = pnand %p3808_p6, %p4000_p9  ;;  %p3817_p4 = por %p3816_p11, %p3815_p1 }
  0x49   : > { %p3811_p10 = pneg %p3810_p8 }
  0x4b   : > { %p3818_p5 = pnand %p3817_p4, %p3811_p10 }
  0x4d   : > { %3821 = shalt.err (!%p3818_p5)
}
  0x4e   : > { %3584 = dma.hbm_to_vmem [thread:$0]  (!%p3984_p7), %s4713_s3, 1024, %s244_s14, [#allocation9], %s3899_s24, %s3899_s24, %s3900_s8  }
  0x4f   : > { %s4073_s20 = sadd.s32 1, %s3894_s27   ;;  %s29_s23 = sadd.s32 1, %s3890_s26 }
  0x50   : > { %s26_s10 = ssub.s32 %s3894_s27, %s4073_s20  ;;  %p36_p5 = scmp.ne.s32.totalorder %s3890_s26, %s3886_s25 }
  0x51   : > { %p27_p4 = scmp.eq.s32.totalorder %s26_s10, 0  ;;  %p37_p9 = scmp.eq.s32.totalorder %s3894_s27, 0 }
  0x52   : > { %p3592_p12 = scmp.lt.s32.totalorder %s3894_s27, 2  ;;  %s266_s13 = sand.u32 1, %s3890_s26  }
  0x53   : > { %s4083_s11 = scalar_select %p27_p4, %s3890_s26, %s29_s23  }
  0x54   : > { %p38_p13 = por %p37_p9, %p36_p5  ;;  %s2723_s15 = sshll.u32 %s266_s13, 7 }
  0x55   : > { %s2869_s16 = sshll.u32 %s3894_s27, 11  ;;  %s270_s14 = scalar_lea.vmem [#allocation3], %s2723_s15 }
  0x56   : > { %s4090_s19 = scalar_lea.hbm %s4710_s0, %s2869_s16  ;;  %s277_s21 = sshll.u32 %s270_s14, 4  ;;  %s4092_s21 = int_to_ptr.vmem [resolvable:$true] %s277_s21 }
  0x57   : > { %p4094_p7 = pnand %p3592_p12, %p38_p13  ;;  %s4098_s27 = scalar_lea.sflag [#allocation4], %s266_s13 }
  0x58   : > { %s3822_s12 = scalar_lea.hbm %s4090_s19, 2048  ;;  %s3827_s23 = scalar_lea.hbm %s4710_s0, 4096 }
  0x59   : > { %p3823_p0 = scmp.ne.s32.totalorder %s4090_s19, %s3822_s12  ;;  %p3824_p2 = pneg %p4094_p7 }
  0x5a   : > { %p3828_p8 = scmp.lt.u32.totalorder %s4090_s19, %s4710_s0  ;;  %p3829_p10 = scmp.lt.u32.totalorder %s3827_s23, %s3822_s12 }
  0x5b   : > { %p3825_p3 = pnand %p3824_p2, %p3823_p0  ;;  %p3831_p11 = scmp.lt.u32.totalorder %s3822_s12, %s4090_s19 }
  0x5c   : > { %p3830_p1 = por %p3829_p10, %p3828_p8 }
  0x5d   : > { %p3826_p6 = pneg %p3825_p3 }
  0x5e   : > { %p3832_p4 = por %p3831_p11, %p3830_p1 }
  0x60   : > { %p3833_p5 = pnand %p3832_p4, %p3826_p6 }
  0x62   : > { %3836 = shalt.err (!%p3833_p5)
}
  0x63   : > { %s3837_s13 = scalar_lea.vmem %s4092_s21, 2048  ;;  %s3901_s17 = smov [#allocation3]  }
  0x64   : > { %p3838_p9 = scmp.ne.s32.totalorder %s4092_s21, %s3837_s13  ;;  %s3842_s18 = sshll.u32 %s3901_s17, 4  ;;  %s3843_s18 = int_to_ptr.vmem [resolvable:$false] %s3842_s18 }
  0x65   : > { %s3844_s14 = scalar_lea.vmem %s3843_s18, 4096  ;;  %p3845_p0 = scmp.lt.s32.totalorder %s4092_s21, %s3843_s18 }
  0x66   : > { %p3840_p12 = pnand %p3838_p9, %p3824_p2  ;;  %p3846_p3 = scmp.lt.s32.totalorder %s3844_s14, %s3837_s13 }
  0x68   : > { %p3841_p13 = pneg %p3840_p12  ;;  %p3847_p8 = por %p3846_p3, %p3845_p0 }
  0x6a   : > { %p3848_p10 = pnand %p3847_p8, %p3841_p13 }
  0x6c   : > { %3851 = shalt.err (!%p3848_p10)
}
  0x6d   : > { %3588 = dma.hbm_to_vmem [thread:$0]  (!%p4094_p7), %s4090_s19, 2048, %s4092_s21, %s4098_s27, %s3899_s24, %s3899_s24, %s3900_s8  }
  0x6e   : > { %p4726_p2 = scmp.ne.s32.totalorder %s4722_s30, 0 }
  0x6f   : > { %s291_s12 = sand.u32 (!%p4726_p2), 1, %s3886_s25   ;;  %p4727_p6 = scmp.ne.s32.totalorder (!%p4726_p2), %s4721_s29, 0 }
  0x70   : > { %289 = sbr.rel (%p4726_p2) target bundleno = 1105 (0x451), region = 48  ;;  %s2727_s9 = sshll.u32 (!%p4726_p2), %s291_s12, 7 }
  0x71   : > { %s292_s10 = scalar_lea.sflag (!%p4726_p2), [#allocation4], %s291_s12  ;;  %s4132_s23 = scalar_lea.vmem (!%p4726_p2), [#allocation3], %s2727_s9 }
  0x77   : > { %3869 = dma.done.wait (%p4727_p6), %s292_s10, 2048  }
  0x78   : > { %3871 = vsyncadd (%p4727_p6), %s292_s10, 4294965248  ;;  %p4728_p1 = scmp.eq.s32.totalorder %s3962_s28, 0 }
  0x7a   : > { %3873 = dma.done.wait (%p4728_p1), [#allocation6], 10240   ;;  %p4729_p7 = pmov %p4728_p1 }
  0x7b   : > { %p4730_p11 = pmov %p4728_p1 }
  0x7c   : > { %3875 = vsyncadd (%p4729_p7), [#allocation6], 4294957056 }
  0x7d   : > { %3877 = dma.done.wait (%p4730_p11), [#allocation9], 1024   ;;  %p4731_p4 = pmov %p4728_p1 }
  0x7e   : > { %v3634_v0 = vld [vmem:[#allocation5] sm:$0xff]   ;;  %v3635_v1 = vld [vmem:[#allocation5 + $0x8] sm:$0xff]   ;;  %v3636_v2 = vld [vmem:[#allocation5 + $0x10] sm:$0xff]   ;;  %v3902_v48 = vmov 0.0   ;;  %p338_p5 = scmp.lt.s32.totalorder %s3962_s28, 1 }
  0x7f   : > { %3879 = vsyncadd (%p4731_p4), [#allocation9], 4294966272  ;;  %3408 = vmatprep.subr.bf16.mxu0 %v3634_v0  ;;  %v3637_v3 = vld [vmem:[#allocation5 + $0x18] sm:$0xff]   ;;  %v3642_v4 = vld [vmem:[%s4132_s23] sm:$0xff]   ;;  %736 = vst [vmem:[#allocation2] sm:$0xff] %v3902_v48 }
  0x80   : > { %3409 = vmatpush3.bf16.msra.mxu0 %v3634_v0  ;;  %3424 = vmatprep.mubr.bf16.mxu0 %v3642_v4  ;;  %v3638_v5 = vld [vmem:[#allocation5 + $0x20] sm:$0xff]   ;;  %v3639_v6 = vld [vmem:[#allocation5 + $0x28] sm:$0xff]   ;;  %v3640_v7 = vld [vmem:[#allocation5 + $0x30] sm:$0xff]   ;;  %737 = vst [vmem:[#allocation2 + $0x108] sm:$0xff] %v3902_v48  ;;  %s4737_s28 = smov (!%p338_p5, %s3962_s28), 1 }
  0x81   : > { %3410 = vmatprep.subr.bf16.mxu0 %v3635_v1  ;;  %v3641_v8 = vld [vmem:[#allocation5 + $0x38] sm:$0xff]   ;;  %v3658_v9 = vld [vmem:[#allocation7 + $0xc0] sm:$0xff]   ;;  %v3643_v10 = vld [vmem:[%s4132_s23 + $0x8] sm:$0xff]   ;;  %s3560_s22 = smul.u32 224, %s4737_s28 }
  0x82   : > { %v3644_v11 = vld [vmem:[%s4132_s23 + $0x10] sm:$0xff]   ;;  %v3659_v12 = vld [vmem:[#allocation7 + $0x80] sm:$0xff]   ;;  %v3660_v13 = vld [vmem:[#allocation7 + $0xc8] sm:$0xff]  }
  0x83   : > { %v3661_v14 = vld [vmem:[#allocation7 + $0x88] sm:$0xff]   ;;  %v3667_v15 = vld [vmem:[#allocation7 + $0x40] sm:$0xff]   ;;  %v3662_v16 = vld [vmem:[#allocation7 + $0xd0] sm:$0xff]   ;;  %s4630_s16 = scalar_lea.vmem %s4717_s7, %s3560_s22 }
  0x84   : > { %3411 = vmatpush3.bf16.msra.mxu0 %v3635_v1  ;;  %v3669_v17 = vld [vmem:[#allocation7] sm:$0xff]   ;;  %v3645_v18 = vld [vmem:[%s4132_s23 + $0x18] sm:$0xff]   ;;  %2964 = vmatprep.subr.bf16.mxu1 %v3667_v15  ;;  %v3670_v19 = vld [vmem:[#allocation7 + $0x48] sm:$0xff]  }
  0x85   : > { %3412 = vmatprep.subr.bf16.mxu0 %v3636_v2  ;;  %v3646_v20 = vld [vmem:[%s4132_s23 + $0x20] sm:$0xff]   ;;  %2965 = vmatpush3.bf16.msra.mxu1 %v3669_v17  ;;  %v3671_v21 = vld [vmem:[#allocation7 + $0x8] sm:$0xff]   ;;  %v3663_v22 = vld [vmem:[#allocation7 + $0x90] sm:$0xff]  }
  0x86   : > { %2966 = vmatprep.subr.bf16.mxu1 %v3670_v19  ;;  %v3673_v23 = vld [vmem:[#allocation7 + $0x50] sm:$0xff]   ;;  %v3664_v24 = vld [vmem:[#allocation7 + $0xd8] sm:$0xff]   ;;  %v3666_v27 = vld [vmem:[#allocation7 + $0xe0] sm:$0xff]  }
  0x87   : > { %v3665_v25 = vld [vmem:[#allocation7 + $0x98] sm:$0xff]   ;;  %v3675_v26 = vld [vmem:[#allocation7 + $0x10] sm:$0xff]   ;;  %v3647_v29 = vld [vmem:[%s4132_s23 + $0x28] sm:$0xff]  }
  0x88   : > { %3413 = vmatpush3.bf16.msra.mxu0 %v3636_v2  ;;  %v3676_v28 = vld [vmem:[#allocation7 + $0x58] sm:$0xff]   ;;  %v3648_v30 = vld [vmem:[%s4132_s23 + $0x30] sm:$0xff]   ;;  %v3668_v31 = vld [vmem:[#allocation7 + $0xa0] sm:$0xff]  }
  0x89   : > { %3414 = vmatprep.subr.bf16.mxu0 %v3637_v3  ;;  %2967 = vmatpush3.bf16.msra.mxu1 %v3671_v21  ;;  %v3672_v32 = vld [vmem:[#allocation7 + $0xe8] sm:$0xff]   ;;  %v3649_v34 = vld [vmem:[%s4132_s23 + $0x38] sm:$0xff]   ;;  %v3650_v35 = vld [vmem:[%s4132_s23 + $0x40] sm:$0xff]  }
  0x8a   : > { %2968 = vmatprep.subr.bf16.mxu1 %v3673_v23  ;;  %v3674_v33 = vld [vmem:[#allocation7 + $0xa8] sm:$0xff]   ;;  %v3652_v37 = vld [vmem:[%s4132_s23 + $0x50] sm:$0xff]   ;;  %v3653_v38 = vld [vmem:[%s4132_s23 + $0x58] sm:$0xff]  }
  0x8b   : > { %v3651_v36 = vld [vmem:[%s4132_s23 + $0x48] sm:$0xff]   ;;  %v3654_v39 = vld [vmem:[%s4132_s23 + $0x60] sm:$0xff]   ;;  %v3656_v41 = vld [vmem:[%s4132_s23 + $0x70] sm:$0xff]  }
  0x8c   : > { %3415 = vmatpush3.bf16.msra.mxu0 %v3637_v3  ;;  %v3655_v40 = vld [vmem:[%s4132_s23 + $0x68] sm:$0xff]   ;;  %v3657_v42 = vld [vmem:[%s4132_s23 + $0x78] sm:$0xff]   ;;  %v3679_v44 = vld [vmem:[#allocation7 + $0x60] sm:$0xff]  }
  0x8d   : > { %3416 = vmatprep.subr.bf16.mxu0 %v3638_v5  ;;  %2969 = vmatpush3.bf16.msra.mxu1 %v3675_v26  ;;  %v3677_v43 = vld [vmem:[#allocation7 + $0x18] sm:$0xff]   ;;  %v3681_v45 = vld [vmem:[#allocation7 + $0x20] sm:$0xff]   ;;  %v3682_v46 = vld [vmem:[#allocation7 + $0x68] sm:$0xff]  }
  0x8e   : > { %2970 = vmatprep.subr.bf16.mxu1 %v3676_v28  ;;  %v3683_v47 = vld [vmem:[#allocation7 + $0x28] sm:$0xff]   ;;  %v3678_v49 = vld [vmem:[#allocation7 + $0xf0] sm:$0xff]   ;;  %v3688_v53 = vld [vmem:[#allocation7 + $0x78] sm:$0xff]  }
  0x8f   : > { %v3680_v50 = vld [vmem:[#allocation7 + $0xb0] sm:$0xff]   ;;  %v3684_v54 = vld [vmem:[#allocation7 + $0xf8] sm:$0xff]   ;;  %v3690_v57 = vld [vmem:[#allocation7 + $0x1c0] sm:$0xff]  }
  0x90   : > { %3417 = vmatpush3.bf16.msra.mxu0 %v3638_v5  ;;  %v3685_v51 = vld [vmem:[#allocation7 + $0x70] sm:$0xff]   ;;  %v3689_v55 = vld [vmem:[#allocation7 + $0x38] sm:$0xff]   ;;  %v3694_v58 = vld [vmem:[#allocation7 + $0x140] sm:$0xff]  }
  0x91   : > { %3418 = vmatprep.subr.bf16.mxu0 %v3639_v6  ;;  %2971 = vmatpush3.bf16.msra.mxu1 %v3677_v43  ;;  %v3687_v52 = vld [vmem:[#allocation7 + $0x30] sm:$0xff]   ;;  %v3686_v56 = vld [vmem:[#allocation7 + $0xb8] sm:$0xff]   ;;  %v3699_v48 = vld [vmem:[#allocation7 + $0x108] sm:$0xff]  }
  0x92   : > { %2972 = vmatprep.subr.bf16.mxu1 %v3679_v44  ;;  %v4165_v59 = vld [vmem:[%s4714_s4] ss:$0 sm:$0xff] }
  0x94   : > { %3419 = vmatpush3.bf16.msra.mxu0 %v3639_v6 }
  0x95   : > { %3420 = vmatprep.subr.bf16.mxu0 %v3640_v7  ;;  %2973 = vmatpush3.bf16.msra.mxu1 %v3681_v45 }
  0x96   : > { %2974 = vmatprep.subr.bf16.mxu1 %v3682_v46 }
  0x98   : > { %3421 = vmatpush3.bf16.msra.mxu0 %v3640_v7 }
  0x99   : > { %3422 = vmatprep.subr.bf16.mxu0 %v3641_v8  ;;  %2975 = vmatpush3.bf16.msra.mxu1 %v3683_v47  ;;  %v3693_v47 = vld [vmem:[#allocation7 + $0x188] sm:$0xff]  }
  0x9a   : > { %2976 = vmatprep.subr.bf16.mxu1 %v3685_v51  ;;  %v3702_v51 = vld [vmem:[#allocation7 + $0x150] sm:$0xff]  }
  0x9c   : > { %3423 = vmatpush3.bf16.msra.mxu0 %v3641_v8 }
  0x9d   : > { %3064 = vmatprep.subr.bf16.mxu0 %v3658_v9  ;;  %2977 = vmatpush3.bf16.msra.mxu1 %v3687_v52 }
  0x9e   : > { %2978 = vmatprep.subr.bf16.mxu1 %v3688_v53 }
  0x9f   : > { %3425 = vmatmul.mubr.bf16.vlgmr.msra.gmra.mrb[0].mxu0 %v3643_v10 }
  0xa0   : > { %3428 = vmatprep.mubr.bf16.mxu0 %v3644_v11  ;;  %3065 = vmatpush3.bf16.msra.mxu0 %v3659_v12 }
  0xa1   : > { %3066 = vmatprep.subr.bf16.mxu0 %v3660_v13  ;;  %2979 = vmatpush3.bf16.msra.mxu1 %v3689_v55 }
  0xa2   : > { %3164 = vmatprep.subr.bf16.mxu1 %v3694_v58 }
  0xa4   : > { %3067 = vmatpush3.bf16.msra.mxu0 %v3661_v14 }
  0xa5   : > { %3068 = vmatprep.subr.bf16.mxu0 %v3662_v16 }
  0xa7   : > { %3429 = vmatmul.mubr.bf16.gmra.mrb[4].mxu0 %v3645_v18 }
  0xa8   : > { %3432 = vmatprep.mubr.bf16.mxu0 %v3646_v20  ;;  %3069 = vmatpush3.bf16.msra.mxu0 %v3663_v22 }
  0xa9   : > { %3070 = vmatprep.subr.bf16.mxu0 %v3664_v24 }
  0xac   : > { %3071 = vmatpush3.bf16.msra.mxu0 %v3665_v25 }
  0xad   : > { %3072 = vmatprep.subr.bf16.mxu0 %v3666_v27 }
  0xaf   : > { %3433 = vmatmul.mubr.bf16.gmra.mrb[8].mxu0 %v3647_v29 }
  0xb0   : > { %3436 = vmatprep.mubr.bf16.mxu0 %v3648_v30  ;;  %3073 = vmatpush3.bf16.msra.mxu0 %v3668_v31 }
  0xb1   : > { %3074 = vmatprep.subr.bf16.mxu0 %v3672_v32  ;;  %v3691_v32 = vld [vmem:[#allocation7 + $0x180] sm:$0xff]  }
  0xb4   : > { %3075 = vmatpush3.bf16.msra.mxu0 %v3674_v33 }
  0xb5   : > { %3076 = vmatprep.subr.bf16.mxu0 %v3678_v49 }
  0xb7   : > { %3437 = vmatmul.mubr.bf16.gmra.mrb[12].mxu0 %v3649_v34  ;;  %v3695_v34 = vld [vmem:[#allocation7 + $0x100] sm:$0xff]  }
  0xb8   : > { %3440 = vmatprep.mubr.bf16.mxu0 %v3650_v35  ;;  %3077 = vmatpush3.bf16.msra.mxu0 %v3680_v50  ;;  %v3696_v50 = vld [vmem:[#allocation7 + $0x1d0] sm:$0xff]  }
  0xb9   : > { %3078 = vmatprep.subr.bf16.mxu0 %v3684_v54 }
  0xbc   : > { %3079 = vmatpush3.bf16.msra.mxu0 %v3686_v56 }
  0xbd   : > { %3264 = vmatprep.subr.bf16.mxu0 %v3690_v57 }
  0xbf   : > { %3441 = vmatmul.mubr.bf16.gmra.mrb[16].mxu0 %v3651_v36 }
  0xc0   : > { %3444 = vmatprep.mubr.bf16.mxu0 %v3652_v37 }
  0xc7   : > { %3445 = vmatmul.mubr.bf16.gmra.mrb[20].mxu0 %v3653_v38  ;;  %v3692_v38 = vld [vmem:[#allocation7 + $0x1c8] sm:$0xff]  }
  0xc8   : > { %3448 = vmatprep.mubr.bf16.mxu0 %v3654_v39  ;;  %v3698_v39 = vld [vmem:[#allocation7 + $0x148] sm:$0xff]  }
  0xcf   : > { %3449 = vmatmul.mubr.bf16.gmra.mrb[24].mxu0 %v3655_v40 }
  0xd0   : > { %3452 = vmatprep.mubr.bf16.mxu0 %v3656_v41 }
  0xd7   : > { %3453 = vmatmul.mubr.bf16.gmra.mrb[28].mxu0 %v3657_v42 }
 0x172   : > { %v3426_v60 = vpop.f32.mrb[0].mxu0 }
 0x173   : > { %v586_v61 = vadd.f32 %v3426_v60, %v4165_v59  ;;  %v577_v62 = vpop.f32.mrb[1].mxu0 }
 0x174   : > { %v578_v63 = vadd.f32 %v4165_v59, %v577_v62  ;;  %v3427_v0 = vpop.f32.mrb[2].mxu0 }
 0x175   : > { %v706_v1 = vmax.f32 %v586_v61, 0.0  ;;  %v589_v2 = vadd.f32 %v3427_v0, %v4165_v59  ;;  %v580_v3 = vpop.f32.mrb[3].mxu0  ;;  %v3697_v0 = vld [vmem:[#allocation7 + $0x190] sm:$0xff]  }
 0x176   : > { %v704_v4 = vmax.f32 %v578_v63, 0.0  ;;  %v581_v5 = vadd.f32 %v4165_v59, %v580_v3 }
 0x177   : > { %740 = vst [vmem:[#allocation2 + $0x18] sm:$0xff] %v706_v1  ;;  %v707_v6 = vmax.f32 %v589_v2, 0.0 }
 0x178   : > { %738 = vst [vmem:[#allocation2 + $0x8] sm:$0xff] %v704_v4  ;;  %v705_v7 = vmax.f32 %v581_v5, 0.0  ;;  %v3703_v5 = vld [vmem:[#allocation7 + $0x110] sm:$0xff]  }
 0x179   : > { %741 = vst [vmem:[#allocation2 + $0x20] sm:$0xff] %v707_v6  ;;  %v4171_v8 = vpack.c.bf16 %v707_v6, %v706_v1 }
 0x17a   : > { %739 = vst [vmem:[#allocation2 + $0x10] sm:$0xff] %v705_v7  ;;  %v3430_v9 = vpop.f32.mrb[4].mxu0  ;;  %v840_v10 = vpack.c.bf16 %v705_v7, %v704_v4  ;;  %v3700_v4 = vld [vmem:[#allocation7 + $0x1d8] sm:$0xff]  }
 0x17b   : > { %v602_v11 = vadd.f32 %v3430_v9, %v4165_v59  ;;  %v593_v12 = vpop.f32.mrb[5].mxu0 }
 0x17c   : > { %v594_v13 = vadd.f32 %v4165_v59, %v593_v12  ;;  %v3431_v14 = vpop.f32.mrb[6].mxu0  ;;  %1529 = vmatprep.mubr.bf16.mxu1 %v840_v10  ;;  %v3706_v10 = vld [vmem:[#allocation7 + $0x158] sm:$0xff]  }
 0x17d   : > { %v710_v15 = vmax.f32 %v602_v11, 0.0  ;;  %v605_v16 = vadd.f32 %v3431_v14, %v4165_v59  ;;  %v596_v17 = vpop.f32.mrb[7].mxu0 }
 0x17e   : > { %v708_v18 = vmax.f32 %v594_v13, 0.0  ;;  %v597_v19 = vadd.f32 %v4165_v59, %v596_v17 }
 0x17f   : > { %744 = vst [vmem:[#allocation2 + $0x38] sm:$0xff] %v710_v15  ;;  %v711_v20 = vmax.f32 %v605_v16, 0.0  ;;  %v770_v23 = vld [vmem:[#allocation2 + $0x7] sm:$0xff] }
 0x180   : > { %742 = vst [vmem:[#allocation2 + $0x28] sm:$0xff] %v708_v18  ;;  %v709_v21 = vmax.f32 %v597_v19, 0.0  ;;  %v773_v22 = vld [vmem:[#allocation2 + $0x1f] sm:$0xff]  ;;  %v3701_v16 = vld [vmem:[#allocation7 + $0x198] sm:$0xff]  }
 0x181   : > { %745 = vst [vmem:[#allocation2 + $0x40] sm:$0xff] %v711_v20  ;;  %v772_v24 = vld [vmem:[#allocation2 + $0x17] sm:$0xff]  ;;  %v771_v25 = vld [vmem:[#allocation2 + $0xf] sm:$0xff]  ;;  %v4177_v27 = vpack.c.bf16 %v711_v20, %v710_v15 }
 0x182   : > { %v854_v26 = vld [vmem:[#allocation2 + $0x9] sm:$0xff]  ;;  %743 = vst [vmem:[#allocation2 + $0x30] sm:$0xff] %v709_v21  ;;  %v3434_v28 = vpop.f32.mrb[8].mxu0  ;;  %v799_v29 = vpack.c.bf16 %v773_v22, %v772_v24  ;;  %v798_v30 = vpack.c.bf16 %v771_v25, %v770_v23  ;;  %v855_v31 = vld [vmem:[#allocation2 + $0x11] sm:$0xff]  ;;  %v4179_v33 = vpack.c.bf16 %v709_v21, %v708_v18  ;;  %v856_v62 = vld [vmem:[#allocation2 + $0x19] sm:$0xff] }
 0x183   : > { %v618_v35 = vadd.f32 %v3434_v28, %v4165_v59  ;;  %v609_v36 = vpop.f32.mrb[9].mxu0  ;;  %v882_v37 = vpack.c.bf16 %v855_v31, %v854_v26  ;;  %v3704_v18 = vld [vmem:[#allocation7 + $0x1e0] sm:$0xff]   ;;  %v3707_v19 = vld [vmem:[#allocation7 + $0x118] sm:$0xff]  }
 0x184   : > { %v610_v40 = vadd.f32 %v4165_v59, %v609_v36  ;;  %v3435_v41 = vpop.f32.mrb[10].mxu0  ;;  %1674 = vmatprep.mubr.bf16.mxu0 %v799_v29  ;;  %1530 = vmatmul.mubr.bf16.vlgmr.msra.gmra.mrb[0].mxu1 %v798_v30  ;;  %v3710_v23 = vld [vmem:[#allocation7 + $0x160] sm:$0xff]  }
 0x185   : > { %v714_v42 = vmax.f32 %v618_v35, 0.0  ;;  %v621_v43 = vadd.f32 %v3435_v41, %v4165_v59  ;;  %v612_v44 = vpop.f32.mrb[11].mxu0  ;;  %1675 = vmatmul.mubr.bf16.vlgmr.msra.gmra.mrb[32].mxu0 %v882_v37  ;;  %1537 = vmatprep.mubr.bf16.mxu1 %v4171_v8  ;;  %v3708_v35 = vld [vmem:[#allocation7 + $0x1e8] sm:$0xff]   ;;  %v3711_v36 = vld [vmem:[#allocation7 + $0x120] sm:$0xff]  }
 0x186   : > { %v712_v45 = vmax.f32 %v610_v40, 0.0  ;;  %v613_v46 = vadd.f32 %v4165_v59, %v612_v44  ;;  %3265 = vmatpush3.bf16.msra.mxu0 %v3691_v32  ;;  %3165 = vmatpush3.bf16.msra.mxu1 %v3695_v34  ;;  %v3714_v40 = vld [vmem:[#allocation7 + $0x168] sm:$0xff]  }
 0x187   : > { %748 = vst [vmem:[#allocation2 + $0x58] sm:$0xff] %v714_v42  ;;  %v715_v49 = vmax.f32 %v621_v43, 0.0  ;;  %3266 = vmatprep.subr.bf16.mxu0 %v3692_v38  ;;  %3166 = vmatprep.subr.bf16.mxu1 %v3698_v39  ;;  %v774_v53 = vld [vmem:[#allocation2 + $0x27] sm:$0xff] }
 0x188   : > { %746 = vst [vmem:[#allocation2 + $0x48] sm:$0xff] %v712_v45  ;;  %v713_v52 = vmax.f32 %v613_v46, 0.0  ;;  %v857_v54 = vld [vmem:[#allocation2 + $0x21] sm:$0xff]  ;;  %v3709_v46 = vld [vmem:[#allocation7 + $0x1a8] sm:$0xff]  }
 0x189   : > { %749 = vst [vmem:[#allocation2 + $0x60] sm:$0xff] %v715_v49  ;;  %v775_v55 = vld [vmem:[#allocation2 + $0x2f] sm:$0xff]  ;;  %v776_v56 = vld [vmem:[#allocation2 + $0x37] sm:$0xff]  ;;  %v777_v57 = vld [vmem:[#allocation2 + $0x3f] sm:$0xff]  ;;  %v4186_v58 = vpack.c.bf16 %v715_v49, %v714_v42  ;;  %v4193_v3 = vpack.c.bf16 %v857_v54, %v856_v62 }
 0x18a   : > { %747 = vst [vmem:[#allocation2 + $0x50] sm:$0xff] %v713_v52  ;;  %v3438_v60 = vpop.f32.mrb[12].mxu0  ;;  %v4188_v61 = vpack.c.bf16 %v775_v55, %v774_v53  ;;  %3267 = vmatpush3.bf16.msra.mxu0 %v3693_v47  ;;  %v4190_v63 = vpack.c.bf16 %v713_v52, %v712_v45  ;;  %3167 = vmatpush3.bf16.msra.mxu1 %v3699_v48  ;;  %v858_v21 = vld [vmem:[#allocation2 + $0x29] sm:$0xff]  ;;  %v859_v22 = vld [vmem:[#allocation2 + $0x31] sm:$0xff]  ;;  %v3712_v48 = vld [vmem:[#allocation7 + $0x1f0] sm:$0xff]  }
 0x18b   : > { %v634_v1 = vadd.f32 %v3438_v60, %v4165_v59  ;;  %v625_v2 = vpop.f32.mrb[13].mxu0  ;;  %3268 = vmatprep.subr.bf16.mxu0 %v3696_v50  ;;  %3168 = vmatprep.subr.bf16.mxu1 %v3702_v51  ;;  %v4197_v9 = vpack.c.bf16 %v777_v57, %v776_v56  ;;  %v4208_v30 = vpack.c.bf16 %v859_v22, %v858_v21  ;;  %v3715_v49 = vld [vmem:[#allocation7 + $0x128] sm:$0xff]   ;;  %v3718_v52 = vld [vmem:[#allocation7 + $0x170] sm:$0xff]  }
 0x18c   : > { %v626_v6 = vadd.f32 %v4165_v59, %v625_v2  ;;  %v3439_v7 = vpop.f32.mrb[14].mxu0  ;;  %1682 = vmatprep.mubr.bf16.mxu0 %v4188_v61  ;;  %1538 = vmatmul.mubr.bf16.gmra.mrb[4].mxu1 %v799_v29  ;;  %v3705_v29 = vld [vmem:[#allocation7 + $0x1a0] sm:$0xff]   ;;  %v860_v56 = vld [vmem:[#allocation2 + $0x39] sm:$0xff] }
 0x18d   : > { %v718_v11 = vmax.f32 %v634_v1, 0.0  ;;  %v637_v12 = vadd.f32 %v3439_v7, %v4165_v59  ;;  %v628_v13 = vpop.f32.mrb[15].mxu0  ;;  %1683 = vmatmul.mubr.bf16.gmra.mrb[36].mxu0 %v4193_v3  ;;  %1545 = vmatprep.mubr.bf16.mxu1 %v4179_v33  ;;  %v3713_v62 = vld [vmem:[#allocation7 + $0x1b0] sm:$0xff]  }
 0x18e   : > { %v716_v14 = vmax.f32 %v626_v6, 0.0  ;;  %v629_v15 = vadd.f32 %v4165_v59, %v628_v13  ;;  %1690 = vmatprep.mubr.bf16.mxu0 %v4197_v9  ;;  %3269 = vmatpush3.bf16.msra.mxu0 %v3697_v0 }
 0x18f   : > { %752 = vst [vmem:[#allocation2 + $0x78] sm:$0xff] %v718_v11  ;;  %v719_v17 = vmax.f32 %v637_v12, 0.0  ;;  %3270 = vmatprep.subr.bf16.mxu0 %v3700_v4  ;;  %3169 = vmatpush3.bf16.msra.mxu1 %v3703_v5  ;;  %v778_v31 = vld [vmem:[#allocation2 + $0x47] sm:$0xff] }
 0x190   : > { %750 = vst [vmem:[#allocation2 + $0x68] sm:$0xff] %v716_v14  ;;  %v717_v20 = vmax.f32 %v629_v15, 0.0  ;;  %3170 = vmatprep.subr.bf16.mxu1 %v3706_v10  ;;  %v861_v51 = vld [vmem:[#allocation2 + $0x41] sm:$0xff] }
 0x191   : > { %753 = vst [vmem:[#allocation2 + $0x80] sm:$0xff] %v719_v17  ;;  %v779_v24 = vld [vmem:[#allocation2 + $0x4f] sm:$0xff]  ;;  %v4204_v25 = vpack.c.bf16 %v719_v17, %v718_v11  ;;  %v780_v53 = vld [vmem:[#allocation2 + $0x57] sm:$0xff]  ;;  %v781_v54 = vld [vmem:[#allocation2 + $0x5f] sm:$0xff]  ;;  %v4224_v0 = vpack.c.bf16 %v861_v51, %v860_v56 }
 0x192   : > { %751 = vst [vmem:[#allocation2 + $0x70] sm:$0xff] %v717_v20  ;;  %v3442_v26 = vpop.f32.mrb[16].mxu0  ;;  %v4206_v28 = vpack.c.bf16 %v717_v20, %v716_v14  ;;  %3271 = vmatpush3.bf16.msra.mxu0 %v3701_v16  ;;  %v4212_v37 = vpack.c.bf16 %v779_v24, %v778_v31  ;;  %v3716_v4 = vld [vmem:[#allocation7 + $0x1f8] sm:$0xff]   ;;  %v3719_v5 = vld [vmem:[#allocation7 + $0x130] sm:$0xff]   ;;  %v4228_v6 = vpack.c.bf16 %v781_v54, %v780_v53  ;;  %v4236_v20 = vld [vmem:[#allocation7 + $0x200] sm:$0xff]  }
 0x193   : > { %v650_v32 = vadd.f32 %v3442_v26, %v4165_v59  ;;  %v641_v34 = vpop.f32.mrb[17].mxu0  ;;  %3272 = vmatprep.subr.bf16.mxu0 %v3704_v18  ;;  %3171 = vmatpush3.bf16.msra.mxu1 %v3707_v19  ;;  %v3720_v11 = vld [vmem:[#allocation7 + $0x178] sm:$0xff]   ;;  %v863_v22 = vld [vmem:[#allocation2 + $0x51] sm:$0xff] }
 0x194   : > { %1546 = vmatmul.mubr.bf16.gmra.mrb[8].mxu1 %v4188_v61  ;;  %v642_v38 = vadd.f32 %v4165_v59, %v641_v34  ;;  %v3443_v39 = vpop.f32.mrb[18].mxu0  ;;  %3172 = vmatprep.subr.bf16.mxu1 %v3710_v23  ;;  %v3717_v17 = vld [vmem:[#allocation7 + $0x1b8] sm:$0xff]  }
 0x195   : > { %1691 = vmatmul.mubr.bf16.gmra.mrb[40].mxu0 %v4208_v30  ;;  %1553 = vmatprep.mubr.bf16.mxu1 %v4177_v27  ;;  %v722_v41 = vmax.f32 %v650_v32, 0.0  ;;  %v653_v42 = vadd.f32 %v3443_v39, %v4165_v59  ;;  %v644_v43 = vpop.f32.mrb[19].mxu0  ;;  %v3721_v19 = vld [vmem:[#allocation7 + $0x138] sm:$0xff]  }
 0x196   : > { %1698 = vmatprep.mubr.bf16.mxu0 %v4212_v37  ;;  %v720_v44 = vmax.f32 %v642_v38, 0.0  ;;  %v645_v45 = vadd.f32 %v4165_v59, %v644_v43  ;;  %3273 = vmatpush3.bf16.msra.mxu0 %v3705_v29  ;;  %v862_v21 = vld [vmem:[#allocation2 + $0x49] sm:$0xff] }
 0x197   : > { %756 = vst [vmem:[#allocation2 + $0x98] sm:$0xff] %v722_v41  ;;  %v723_v47 = vmax.f32 %v653_v42, 0.0  ;;  %3274 = vmatprep.subr.bf16.mxu0 %v3708_v35  ;;  %3173 = vmatpush3.bf16.msra.mxu1 %v3711_v36  ;;  %v4242_v32 = vpack.c.bf16 %v863_v22, %v862_v21  ;;  %v782_v34 = vld [vmem:[#allocation2 + $0x67] sm:$0xff] }
 0x198   : > { %754 = vst [vmem:[#allocation2 + $0x88] sm:$0xff] %v720_v44  ;;  %v721_v50 = vmax.f32 %v645_v45, 0.0  ;;  %3174 = vmatprep.subr.bf16.mxu1 %v3714_v40  ;;  %v785_v51 = vld [vmem:[#allocation2 + $0x7f] sm:$0xff] }
 0x199   : > { %757 = vst [vmem:[#allocation2 + $0xa0] sm:$0xff] %v723_v47  ;;  %v4220_v55 = vpack.c.bf16 %v723_v47, %v722_v41  ;;  %v783_v24 = vld [vmem:[#allocation2 + $0x6f] sm:$0xff]  ;;  %v864_v47 = vld [vmem:[#allocation2 + $0x59] sm:$0xff] }
 0x19a   : > { %755 = vst [vmem:[#allocation2 + $0x90] sm:$0xff] %v721_v50  ;;  %v3446_v57 = vpop.f32.mrb[20].mxu0  ;;  %v4222_v60 = vpack.c.bf16 %v721_v50, %v720_v44  ;;  %3275 = vmatpush3.bf16.msra.mxu0 %v3709_v46  ;;  %v4247_v38 = vpack.c.bf16 %v783_v24, %v782_v34  ;;  %v784_v50 = vld [vmem:[#allocation2 + $0x77] sm:$0xff] }
 0x19b   : > { %v666_v1 = vadd.f32 %v3446_v57, %v4165_v59  ;;  %v657_v2 = vpop.f32.mrb[21].mxu0  ;;  %3276 = vmatprep.subr.bf16.mxu0 %v3712_v48  ;;  %3175 = vmatpush3.bf16.msra.mxu1 %v3715_v49  ;;  %v865_v48 = vld [vmem:[#allocation2 + $0x61] sm:$0xff] }
 0x19c   : > { %1554 = vmatmul.mubr.bf16.gmra.mrb[12].mxu1 %v4197_v9  ;;  %v658_v7 = vadd.f32 %v4165_v59, %v657_v2  ;;  %v3447_v10 = vpop.f32.mrb[22].mxu0  ;;  %3176 = vmatprep.subr.bf16.mxu1 %v3718_v52  ;;  %v4260_v56 = vpack.c.bf16 %v865_v48, %v864_v47 }
 0x19d   : > { %1699 = vmatmul.mubr.bf16.gmra.mrb[44].mxu0 %v4224_v0  ;;  %1561 = vmatprep.mubr.bf16.mxu1 %v4190_v63  ;;  %v726_v12 = vmax.f32 %v666_v1, 0.0  ;;  %v669_v13 = vadd.f32 %v3447_v10, %v4165_v59  ;;  %v660_v14 = vpop.f32.mrb[23].mxu0  ;;  %v4264_v1 = vpack.c.bf16 %v785_v51, %v784_v50 }
 0x19e   : > { %1706 = vmatprep.mubr.bf16.mxu0 %v4228_v6  ;;  %v724_v15 = vmax.f32 %v658_v7, 0.0  ;;  %v661_v16 = vadd.f32 %v4165_v59, %v660_v14  ;;  %3277 = vmatpush3.bf16.msra.mxu0 %v3713_v62  ;;  %v866_v14 = vld [vmem:[#allocation2 + $0x69] sm:$0xff] }
 0x19f   : > { %760 = vst [vmem:[#allocation2 + $0xb8] sm:$0xff] %v726_v12  ;;  %v727_v18 = vmax.f32 %v669_v13, 0.0  ;;  %3278 = vmatprep.subr.bf16.mxu0 %v3716_v4  ;;  %3177 = vmatpush3.bf16.msra.mxu1 %v3719_v5  ;;  %v869_v24 = vld [vmem:[#allocation2 + $0x81] sm:$0xff] }
 0x1a0   : > { %758 = vst [vmem:[#allocation2 + $0xa8] sm:$0xff] %v724_v15  ;;  %v725_v23 = vmax.f32 %v661_v16, 0.0  ;;  %3178 = vmatprep.subr.bf16.mxu1 %v3720_v11  ;;  %v789_v34 = vld [vmem:[#allocation2 + $0x9f] sm:$0xff] }
 0x1a1   : > { %761 = vst [vmem:[#allocation2 + $0xc0] sm:$0xff] %v727_v18  ;;  %v4238_v26 = vpack.c.bf16 %v727_v18, %v726_v12  ;;  %v787_v18 = vld [vmem:[#allocation2 + $0x8f] sm:$0xff] }
 0x1a2   : > { %759 = vst [vmem:[#allocation2 + $0xb0] sm:$0xff] %v725_v23  ;;  %v3450_v29 = vpop.f32.mrb[24].mxu0  ;;  %v4240_v31 = vpack.c.bf16 %v725_v23, %v724_v15  ;;  %3279 = vmatpush3.bf16.msra.mxu0 %v3717_v17  ;;  %v867_v15 = vld [vmem:[#allocation2 + $0x71] sm:$0xff]  ;;  %v786_v17 = vld [vmem:[#allocation2 + $0x87] sm:$0xff] }
 0x1a3   : > { %v682_v35 = vadd.f32 %v3450_v29, %v4165_v59  ;;  %v673_v36 = vpop.f32.mrb[25].mxu0  ;;  %3179 = vmatpush3.bf16.msra.mxu1 %v3721_v19  ;;  %3456 = vmatprep.subr.bf16.mxu0 %v4236_v20  ;;  %v4276_v22 = vpack.c.bf16 %v867_v15, %v866_v14  ;;  %v4279_v23 = vpack.c.bf16 %v787_v18, %v786_v17  ;;  %v788_v29 = vld [vmem:[#allocation2 + $0x97] sm:$0xff] }
 0x1a4   : > { %1562 = vmatmul.mubr.bf16.gmra.mrb[16].mxu1 %v4212_v37  ;;  %v674_v39 = vadd.f32 %v4165_v59, %v673_v36  ;;  %v3451_v40 = vpop.f32.mrb[26].mxu0  ;;  %3544 = vmatprep.subr.bf16.mxu1 %v4236_v20  ;;  %v4287_v36 = vpack.c.bf16 %v789_v34, %v788_v29 }
 0x1a5   : > { %1707 = vmatmul.mubr.bf16.gmra.mrb[48].mxu0 %v4242_v32  ;;  %1569 = vmatprep.mubr.bf16.mxu1 %v4186_v58  ;;  %v730_v41 = vmax.f32 %v682_v35, 0.0  ;;  %v685_v42 = vadd.f32 %v3451_v40, %v4165_v59  ;;  %v676_v43 = vpop.f32.mrb[27].mxu0  ;;  %v871_v40 = vld [vmem:[#allocation2 + $0x91] sm:$0xff] }
 0x1a6   : > { %1714 = vmatprep.mubr.bf16.mxu0 %v4247_v38  ;;  %v728_v44 = vmax.f32 %v674_v39, 0.0  ;;  %v677_v45 = vadd.f32 %v4165_v59, %v676_v43  ;;  %v870_v39 = vld [vmem:[#allocation2 + $0x89] sm:$0xff] }
 0x1a7   : > { %764 = vst [vmem:[#allocation2 + $0xd8] sm:$0xff] %v730_v41  ;;  %v731_v46 = vmax.f32 %v685_v42, 0.0  ;;  %v4292_v43 = vpack.c.bf16 %v871_v40, %v870_v39  ;;  %v3723_v39 = vld [vmem:[#allocation7 + $0x208] sm:$0xff]   ;;  %v3724_v40 = vld [vmem:[#allocation7 + $0x210] sm:$0xff]  }
 0x1a8   : > { %762 = vst [vmem:[#allocation2 + $0xc8] sm:$0xff] %v728_v44  ;;  %v729_v49 = vmax.f32 %v677_v45, 0.0  ;;  %v872_v45 = vld [vmem:[#allocation2 + $0x99] sm:$0xff] }
 0x1a9   : > { %765 = vst [vmem:[#allocation2 + $0xe0] sm:$0xff] %v731_v46  ;;  %v4256_v52 = vpack.c.bf16 %v731_v46, %v730_v41  ;;  %v790_v41 = vld [vmem:[#allocation2 + $0xa7] sm:$0xff]  ;;  %v791_v42 = vld [vmem:[#allocation2 + $0xaf] sm:$0xff]  ;;  %v792_v47 = vld [vmem:[#allocation2 + $0xb7] sm:$0xff] }
 0x1aa   : > { %763 = vst [vmem:[#allocation2 + $0xd0] sm:$0xff] %v729_v49  ;;  %v3454_v53 = vpop.f32.mrb[28].mxu0  ;;  %v4258_v54 = vpack.c.bf16 %v729_v49, %v728_v44  ;;  %v4295_v44 = vpack.c.bf16 %v791_v42, %v790_v41  ;;  %v873_v46 = vld [vmem:[#allocation2 + $0xa1] sm:$0xff]  ;;  %v874_v51 = vld [vmem:[#allocation2 + $0xa9] sm:$0xff] }
 0x1ab   : > { %v698_v57 = vadd.f32 %v3454_v53, %v4165_v59  ;;  %v689_v62 = vpop.f32.mrb[29].mxu0  ;;  %v793_v48 = vld [vmem:[#allocation2 + $0xbf] sm:$0xff]  ;;  %v4300_v49 = vpack.c.bf16 %v873_v46, %v872_v45  ;;  %v875_v53 = vld [vmem:[#allocation2 + $0xb1] sm:$0xff] }
 0x1ac   : > { %1570 = vmatmul.mubr.bf16.gmra.mrb[20].mxu1 %v4228_v6  ;;  %v690_v2 = vadd.f32 %v4165_v59, %v689_v62  ;;  %v3455_v4 = vpop.f32.mrb[30].mxu0  ;;  %v4303_v50 = vpack.c.bf16 %v793_v48, %v792_v47 }
 0x1ad   : > { %1715 = vmatmul.mubr.bf16.gmra.mrb[52].mxu0 %v4260_v56  ;;  %1577 = vmatprep.mubr.bf16.mxu1 %v4206_v28  ;;  %v734_v5 = vmax.f32 %v698_v57, 0.0  ;;  %v701_v7 = vadd.f32 %v3455_v4, %v4165_v59  ;;  %v692_v10 = vpop.f32.mrb[31].mxu0 }
 0x1ae   : > { %1722 = vmatprep.mubr.bf16.mxu0 %v4264_v1  ;;  %v732_v11 = vmax.f32 %v690_v2, 0.0  ;;  %v693_v12 = vadd.f32 %v4165_v59, %v692_v10  ;;  %v868_v59 = vld [vmem:[#allocation2 + $0x79] sm:$0xff]  ;;  %v4308_v2 = vpack.c.bf16 %v875_v53, %v874_v51 }
 0x1af   : > { %768 = vst [vmem:[#allocation2 + $0xf8] sm:$0xff] %v734_v5  ;;  %v735_v13 = vmax.f32 %v701_v7, 0.0  ;;  %v4284_v35 = vpack.c.bf16 %v869_v24, %v868_v59  ;;  %v794_v57 = vld [vmem:[#allocation2 + $0xc7] sm:$0xff] }
 0x1b0   : > { %766 = vst [vmem:[#allocation2 + $0xe8] sm:$0xff] %v732_v11  ;;  %v733_v16 = vmax.f32 %v693_v12, 0.0  ;;  %v877_v7 = vld [vmem:[#allocation2 + $0xc1] sm:$0xff]  ;;  %v880_v24 = vld [vmem:[#allocation2 + $0xd9] sm:$0xff] }
 0x1b1   : > { %769 = vst [vmem:[#allocation2 + $0x100] sm:$0xff] %v735_v13  ;;  %v4272_v19 = vpack.c.bf16 %v735_v13, %v734_v5  ;;  %v795_v62 = vld [vmem:[#allocation2 + $0xcf] sm:$0xff]  ;;  %v876_v5 = vld [vmem:[#allocation2 + $0xb9] sm:$0xff] }
 0x1b2   : > { %767 = vst [vmem:[#allocation2 + $0xf0] sm:$0xff] %v733_v16  ;;  %v4274_v21 = vpack.c.bf16 %v733_v16, %v732_v11  ;;  %v4311_v4 = vpack.c.bf16 %v795_v62, %v794_v57  ;;  %v796_v10 = vld [vmem:[#allocation2 + $0xd7] sm:$0xff]  ;;  %v797_v11 = vld [vmem:[#allocation2 + $0xdf] sm:$0xff]  ;;  %v4316_v12 = vpack.c.bf16 %v877_v7, %v876_v5  ;;  %v878_v14 = vld [vmem:[#allocation2 + $0xc9] sm:$0xff] }
 0x1b3   : > { %v4319_v13 = vpack.c.bf16 %v797_v11, %v796_v10  ;;  %v879_v15 = vld [vmem:[#allocation2 + $0xd1] sm:$0xff] }
 0x1b4   : > { %1578 = vmatmul.mubr.bf16.gmra.mrb[24].mxu1 %v4247_v38  ;;  %v4324_v18 = vpack.c.bf16 %v879_v15, %v878_v14 }
 0x1b5   : > { %1723 = vmatmul.mubr.bf16.gmra.mrb[56].mxu0 %v4276_v22  ;;  %1585 = vmatprep.mubr.bf16.mxu1 %v4204_v25 }
 0x1b6   : > { %1730 = vmatprep.mubr.bf16.mxu0 %v4279_v23 }
 0x1b7   : > { %v896_v16 = vld [vmem:[#allocation2 + $0xe7] sm:$0xff] }
 0x1b8   : > { %v881_v29 = vld [vmem:[#allocation2 + $0xe1] sm:$0xff] }
 0x1b9   : > { %v897_v17 = vld [vmem:[#allocation2 + $0xef] sm:$0xff]  ;;  %v4332_v34 = vpack.c.bf16 %v881_v29, %v880_v24 }
 0x1ba   : > { %v4327_v59 = vpack.c.bf16 %v897_v17, %v896_v16 }
 0x1bc   : > { %1586 = vmatmul.mubr.bf16.gmra.mrb[28].mxu1 %v4264_v1 }
 0x1bd   : > { %1731 = vmatmul.mubr.bf16.gmra.mrb[60].mxu0 %v4284_v35  ;;  %1593 = vmatprep.mubr.bf16.mxu1 %v4222_v60 }
 0x1be   : > { %1738 = vmatprep.mubr.bf16.mxu0 %v4287_v36 }
 0x1c4   : > { %1594 = vmatmul.mubr.bf16.gmra.mrb[32].mxu1 %v4279_v23 }
 0x1c5   : > { %1739 = vmatmul.mubr.bf16.gmra.mrb[64].mxu0 %v4292_v43  ;;  %1601 = vmatprep.mubr.bf16.mxu1 %v4220_v55 }
 0x1c6   : > { %1746 = vmatprep.mubr.bf16.mxu0 %v4295_v44 }
 0x1cc   : > { %1602 = vmatmul.mubr.bf16.gmra.mrb[36].mxu1 %v4287_v36 }
 0x1cd   : > { %1747 = vmatmul.mubr.bf16.gmra.mrb[68].mxu0 %v4300_v49  ;;  %1609 = vmatprep.mubr.bf16.mxu1 %v4240_v31 }
 0x1ce   : > { %1754 = vmatprep.mubr.bf16.mxu0 %v4303_v50 }
 0x1d4   : > { %1610 = vmatmul.mubr.bf16.gmra.mrb[40].mxu1 %v4295_v44 }
 0x1d5   : > { %1755 = vmatmul.mubr.bf16.gmra.mrb[72].mxu0 %v4308_v2  ;;  %1617 = vmatprep.mubr.bf16.mxu1 %v4238_v26 }
 0x1d6   : > { %1762 = vmatprep.mubr.bf16.mxu0 %v4311_v4 }
 0x1dc   : > { %1618 = vmatmul.mubr.bf16.gmra.mrb[44].mxu1 %v4303_v50 }
 0x1dd   : > { %1763 = vmatmul.mubr.bf16.gmra.mrb[76].mxu0 %v4316_v12  ;;  %1625 = vmatprep.mubr.bf16.mxu1 %v4258_v54 }
 0x1de   : > { %1770 = vmatprep.mubr.bf16.mxu0 %v4319_v13 }
 0x1e4   : > { %1626 = vmatmul.mubr.bf16.gmra.mrb[48].mxu1 %v4311_v4 }
 0x1e5   : > { %1771 = vmatmul.mubr.bf16.gmra.mrb[80].mxu0 %v4324_v18  ;;  %1633 = vmatprep.mubr.bf16.mxu1 %v4256_v52 }
 0x1e6   : > { %1778 = vmatprep.mubr.bf16.mxu0 %v4327_v59 }
 0x1ec   : > { %1634 = vmatmul.mubr.bf16.gmra.mrb[52].mxu1 %v4319_v13 }
 0x1ed   : > { %1779 = vmatmul.mubr.bf16.gmra.mrb[84].mxu0 %v4332_v34  ;;  %1819 = vmatprep.mubr.bf16.mxu1 %v4193_v3  ;;  %v3725_v3 = vld [vmem:[#allocation7 + $0x218] sm:$0xff]  }
 0x1ee   : > { %1964 = vmatprep.mubr.bf16.mxu0 %v4179_v33 }
 0x1f4   : > { %1820 = vmatmul.mubr.bf16.vlgmr.msra.gmra.mrb[56].mxu1 %v4171_v8  ;;  %v3726_v8 = vld [vmem:[#allocation7 + $0x220] sm:$0xff]  }
 0x1f5   : > { %1965 = vmatmul.mubr.bf16.vlgmr.msra.gmra.mrb[88].mxu0 %v4188_v61  ;;  %1827 = vmatprep.mubr.bf16.mxu1 %v4208_v30  ;;  %v3727_v61 = vld [vmem:[#allocation7 + $0x228] sm:$0xff]  }
 0x1f6   : > { %3457 = vmatpush3.bf16.msra.mxu0 %v4236_v20  ;;  %1972 = vmatprep.mubr.bf16.mxu0 %v4177_v27 }
 0x1f7   : > { %3458 = vmatprep.subr.bf16.mxu0 %v3723_v39  ;;  %3552 = vmatpush3.bf16.msra.mxu1 %v4236_v20 }
 0x1f8   : > { %3545 = vmatprep.subr.bf16.mxu1 %v3723_v39 }
 0x1fa   : > { %3459 = vmatpush3.bf16.msra.mxu0 %v3723_v39 }
 0x1fb   : > { %3460 = vmatprep.subr.bf16.mxu0 %v3724_v40  ;;  %3553 = vmatpush3.bf16.msra.mxu1 %v3723_v39 }
 0x1fc   : > { %1828 = vmatmul.mubr.bf16.gmra.mrb[60].mxu1 %v4179_v33  ;;  %3546 = vmatprep.subr.bf16.mxu1 %v3724_v40  ;;  %v3728_v33 = vld [vmem:[#allocation7 + $0x230] sm:$0xff]  }
 0x1fd   : > { %1973 = vmatmul.mubr.bf16.gmra.mrb[92].mxu0 %v4197_v9  ;;  %1835 = vmatprep.mubr.bf16.mxu1 %v4224_v0  ;;  %v3729_v9 = vld [vmem:[#allocation7 + $0x238] sm:$0xff]  }
 0x1fe   : > { %1980 = vmatprep.mubr.bf16.mxu0 %v4190_v63  ;;  %3461 = vmatpush3.bf16.msra.mxu0 %v3724_v40 }
 0x1ff   : > { %3462 = vmatprep.subr.bf16.mxu0 %v3725_v3  ;;  %3554 = vmatpush3.bf16.msra.mxu1 %v3724_v40 }
 0x200   : > { %3547 = vmatprep.subr.bf16.mxu1 %v3725_v3 }
 0x202   : > { %3463 = vmatpush3.bf16.msra.mxu0 %v3725_v3 }
 0x203   : > { %3464 = vmatprep.subr.bf16.mxu0 %v3726_v8  ;;  %3555 = vmatpush3.bf16.msra.mxu1 %v3725_v3 }
 0x204   : > { %1836 = vmatmul.mubr.bf16.gmra.mrb[64].mxu1 %v4177_v27  ;;  %3548 = vmatprep.subr.bf16.mxu1 %v3726_v8  ;;  %v902_v27 = vld [vmem:[#allocation2 + $0xe9] sm:$0xff] }
 0x205   : > { %1981 = vmatmul.mubr.bf16.gmra.mrb[96].mxu0 %v4212_v37  ;;  %1843 = vmatprep.mubr.bf16.mxu1 %v4242_v32  ;;  %v4397_v37 = vld [vmem:[%s4715_s5] ss:$0 sm:$0xff] }
 0x206   : > { %1988 = vmatprep.mubr.bf16.mxu0 %v4186_v58  ;;  %3465 = vmatpush3.bf16.msra.mxu0 %v3726_v8 }
 0x207   : > { %3466 = vmatprep.subr.bf16.mxu0 %v3727_v61  ;;  %3556 = vmatpush3.bf16.msra.mxu1 %v3726_v8 }
 0x208   : > { %3549 = vmatprep.subr.bf16.mxu1 %v3727_v61 }
 0x20a   : > { %3467 = vmatpush3.bf16.msra.mxu0 %v3727_v61 }
 0x20b   : > { %3468 = vmatprep.subr.bf16.mxu0 %v3728_v33  ;;  %3557 = vmatpush3.bf16.msra.mxu1 %v3727_v61 }
 0x20c   : > { %1844 = vmatmul.mubr.bf16.gmra.mrb[68].mxu1 %v4190_v63  ;;  %3550 = vmatprep.subr.bf16.mxu1 %v3728_v33 }
 0x20d   : > { %1989 = vmatmul.mubr.bf16.gmra.mrb[100].mxu0 %v4228_v6  ;;  %1851 = vmatprep.mubr.bf16.mxu1 %v4260_v56  ;;  %v906_v6 = vld [vmem:[#allocation2 + $0xff] sm:$0xff] }
 0x20e   : > { %1996 = vmatprep.mubr.bf16.mxu0 %v4206_v28  ;;  %3469 = vmatpush3.bf16.msra.mxu0 %v3728_v33 }
 0x20f   : > { %3470 = vmatprep.subr.bf16.mxu0 %v3729_v9  ;;  %3558 = vmatpush3.bf16.msra.mxu1 %v3728_v33 }
 0x210   : > { %3551 = vmatprep.subr.bf16.mxu1 %v3729_v9 }
 0x212   : > { %3471 = vmatpush3.bf16.msra.mxu0 %v3729_v9 }
 0x213   : > { %3559 = vmatpush3.bf16.msra.mxu1 %v3729_v9 }
 0x214   : > { %1852 = vmatmul.mubr.bf16.gmra.mrb[72].mxu1 %v4186_v58  ;;  %v903_v58 = vld [vmem:[#allocation2 + $0xf1] sm:$0xff] }
 0x215   : > { %1997 = vmatmul.mubr.bf16.gmra.mrb[104].mxu0 %v4247_v38  ;;  %1859 = vmatprep.mubr.bf16.mxu1 %v4276_v22  ;;  %v4388_v63 = vpack.c.bf16 %v903_v58, %v902_v27 }
 0x216   : > { %2004 = vmatprep.mubr.bf16.mxu0 %v4204_v25 }
 0x21c   : > { %1860 = vmatmul.mubr.bf16.gmra.mrb[76].mxu1 %v4206_v28 }
 0x21d   : > { %2005 = vmatmul.mubr.bf16.gmra.mrb[108].mxu0 %v4264_v1  ;;  %1867 = vmatprep.mubr.bf16.mxu1 %v4284_v35 }
 0x21e   : > { %2012 = vmatprep.mubr.bf16.mxu0 %v4222_v60 }
 0x224   : > { %1868 = vmatmul.mubr.bf16.gmra.mrb[80].mxu1 %v4204_v25 }
 0x225   : > { %2013 = vmatmul.mubr.bf16.gmra.mrb[112].mxu0 %v4279_v23  ;;  %1875 = vmatprep.mubr.bf16.mxu1 %v4292_v43 }
 0x226   : > { %2020 = vmatprep.mubr.bf16.mxu0 %v4220_v55 }
 0x22c   : > { %1876 = vmatmul.mubr.bf16.gmra.mrb[84].mxu1 %v4222_v60  ;;  %v905_v60 = vld [vmem:[#allocation2 + $0xf7] sm:$0xff] }
 0x22d   : > { %2021 = vmatmul.mubr.bf16.gmra.mrb[116].mxu0 %v4287_v36  ;;  %1883 = vmatprep.mubr.bf16.mxu1 %v4300_v49  ;;  %v907_v36 = vpack.c.bf16 %v906_v6, %v905_v60 }
 0x22e   : > { %2028 = vmatprep.mubr.bf16.mxu0 %v4240_v31 }
 0x234   : > { %1884 = vmatmul.mubr.bf16.gmra.mrb[88].mxu1 %v4220_v55 }
 0x235   : > { %2029 = vmatmul.mubr.bf16.gmra.mrb[120].mxu0 %v4295_v44  ;;  %1891 = vmatprep.mubr.bf16.mxu1 %v4308_v2 }
 0x236   : > { %2036 = vmatprep.mubr.bf16.mxu0 %v4238_v26 }
 0x23c   : > { %1892 = vmatmul.mubr.bf16.gmra.mrb[92].mxu1 %v4240_v31 }
 0x23d   : > { %2037 = vmatmul.mubr.bf16.gmra.mrb[124].mxu0 %v4303_v50  ;;  %1899 = vmatprep.mubr.bf16.mxu1 %v4316_v12 }
 0x23e   : > { %2044 = vmatprep.mubr.bf16.mxu0 %v4258_v54 }
 0x244   : > { %1900 = vmatmul.mubr.bf16.gmra.mrb[96].mxu1 %v4238_v26 }
 0x245   : > { %2045 = vmatmul.mubr.bf16.gmra.mrb[128].mxu0 %v4311_v4  ;;  %1907 = vmatprep.mubr.bf16.mxu1 %v4324_v18 }
 0x246   : > { %2052 = vmatprep.mubr.bf16.mxu0 %v4256_v52 }
 0x24c   : > { %1908 = vmatmul.mubr.bf16.gmra.mrb[100].mxu1 %v4258_v54 }
 0x24d   : > { %2053 = vmatmul.mubr.bf16.gmra.mrb[132].mxu0 %v4319_v13  ;;  %1915 = vmatprep.mubr.bf16.mxu1 %v4332_v34 }
 0x24e   : > { %2060 = vmatprep.mubr.bf16.mxu0 %v4274_v21 }
 0x254   : > { %1916 = vmatmul.mubr.bf16.gmra.mrb[104].mxu1 %v4256_v52 }
 0x255   : > { %2061 = vmatmul.mubr.bf16.gmra.mrb[136].mxu0 %v4327_v59  ;;  %1923 = vmatprep.mubr.bf16.mxu1 %v4388_v63 }
 0x256   : > { %2068 = vmatprep.mubr.bf16.mxu0 %v4272_v19 }
 0x257   : > { %v2980_v25 = vpop.f32.mrb[0].mxu1 }
 0x258   : > { %v3080_v28 = vpop.f32.mrb[32].mxu0  ;;  %v2981_v55 = vpop.f32.mrb[1].mxu1 }
 0x259   : > { %v2982_v20 = vadd.f32 %v2981_v55, %v2980_v25  ;;  %v3081_v26 = vpop.f32.mrb[33].mxu0  ;;  %v2983_v31 = vpop.f32.mrb[2].mxu1 }
 0x25a   : > { %v3082_v38 = vadd.f32 %v3081_v26, %v3080_v28  ;;  %v3083_v52 = vpop.f32.mrb[34].mxu0  ;;  %v2984_v54 = vpop.f32.mrb[3].mxu1 }
 0x25b   : > { %v1532_v1 = vadd.f32 %v2982_v20, %v4397_v37  ;;  %v2985_v23 = vadd.f32 %v2984_v54, %v2983_v31  ;;  %v3084_v19 = vpop.f32.mrb[35].mxu0 }
 0x25c   : > { %v3085_v41 = vadd.f32 %v3084_v19, %v3083_v52  ;;  %1924 = vmatmul.mubr.bf16.gmra.mrb[108].mxu1 %v4274_v21  ;;  %v912_v52 = vld [vmem:[#allocation2 + $0x101] sm:$0xff] }
 0x25d   : > { %v4401_v42 = vadd.f32 %v3082_v38, %v1532_v1  ;;  %v1535_v44 = vadd.f32 %v2985_v23, %v4397_v37  ;;  %2069 = vmatmul.mubr.bf16.gmra.mrb[140].mxu0 %v907_v36  ;;  %3484 = vmatprep.mubr.bf16.mxu1 %v4292_v43  ;;  %v911_v38 = vld [vmem:[#allocation2 + $0xf9] sm:$0xff] }
 0x25e   : > { %3472 = vmatprep.mubr.bf16.mxu0 %v4208_v30 }
 0x25f   : > { %v4406_v45 = vadd.f32 %v3085_v41, %v1535_v44  ;;  %v2986_v46 = vpop.f32.mrb[4].mxu1 }
 0x260   : > { %v3086_v47 = vpop.f32.mrb[36].mxu0  ;;  %v2987_v48 = vpop.f32.mrb[5].mxu1 }
 0x261   : > { %v2988_v50 = vadd.f32 %v2987_v48, %v2986_v46  ;;  %v3087_v51 = vpop.f32.mrb[37].mxu0  ;;  %v2989_v53 = vpop.f32.mrb[6].mxu1  ;;  %v913_v46 = vpack.c.bf16 %v912_v52, %v911_v38 }
 0x262   : > { %v3088_v57 = vadd.f32 %v3087_v51, %v3086_v47  ;;  %v3089_v62 = vpop.f32.mrb[38].mxu0  ;;  %v2990_v21 = vpop.f32.mrb[7].mxu1 }
 0x263   : > { %v1540_v4 = vadd.f32 %v2988_v50, %v4397_v37  ;;  %v2991_v5 = vadd.f32 %v2990_v21, %v2989_v53  ;;  %v3090_v7 = vpop.f32.mrb[39].mxu0 }
 0x264   : > { %v3091_v10 = vadd.f32 %v3090_v7, %v3089_v62  ;;  %3485 = vmatmul.mubr.bf16.vlgmr.msra.gmra.mrb[112].mxu1 %v4300_v49 }
 0x265   : > { %v4410_v43 = vadd.f32 %v3088_v57, %v1540_v4  ;;  %v1543_v30 = vadd.f32 %v2991_v5, %v4397_v37  ;;  %3473 = vmatmul.mubr.bf16.vlgmr.msra.gmra.mrb[144].mxu0 %v4224_v0  ;;  %3488 = vmatprep.mubr.bf16.mxu1 %v4308_v2 }
 0x266   : > { %3476 = vmatprep.mubr.bf16.mxu0 %v4242_v32 }
 0x267   : > { %v4416_v11 = vadd.f32 %v3091_v10, %v1543_v30  ;;  %v2992_v13 = vpop.f32.mrb[8].mxu1 }
 0x268   : > { %v3092_v14 = vpop.f32.mrb[40].mxu0  ;;  %v2993_v15 = vpop.f32.mrb[9].mxu1 }
 0x269   : > { %v2994_v16 = vadd.f32 %v2993_v15, %v2992_v13  ;;  %v3093_v17 = vpop.f32.mrb[41].mxu0  ;;  %v2995_v59 = vpop.f32.mrb[10].mxu1 }
 0x26a   : > { %v3094_v24 = vadd.f32 %v3093_v17, %v3092_v14  ;;  %v3095_v49 = vpop.f32.mrb[42].mxu0  ;;  %v2996_v29 = vpop.f32.mrb[11].mxu1 }
 0x26b   : > { %v1548_v39 = vadd.f32 %v2994_v16, %v4397_v37  ;;  %v2997_v40 = vadd.f32 %v2996_v29, %v2995_v59  ;;  %v3096_v3 = vpop.f32.mrb[43].mxu0 }
 0x26c   : > { %v3097_v0 = vadd.f32 %v3096_v3, %v3095_v49  ;;  %3489 = vmatmul.mubr.bf16.gmra.mrb[116].mxu1 %v4316_v12 }
 0x26d   : > { %v4420_v2 = vadd.f32 %v3094_v24, %v1548_v39  ;;  %v1551_v32 = vadd.f32 %v2997_v40, %v4397_v37  ;;  %3477 = vmatmul.mubr.bf16.gmra.mrb[148].mxu0 %v4260_v56  ;;  %3492 = vmatprep.mubr.bf16.mxu1 %v4324_v18 }
 0x26e   : > { %3480 = vmatprep.mubr.bf16.mxu0 %v4276_v22 }
 0x26f   : > { %v4426_v8 = vadd.f32 %v3097_v0, %v1551_v32  ;;  %v2998_v61 = vpop.f32.mrb[12].mxu1 }
 0x270   : > { %v3098_v33 = vpop.f32.mrb[44].mxu0  ;;  %v2999_v9 = vpop.f32.mrb[13].mxu1 }
 0x271   : > { %v3000_v27 = vadd.f32 %v2999_v9, %v2998_v61  ;;  %v3099_v58 = vpop.f32.mrb[45].mxu0  ;;  %v3001_v25 = vpop.f32.mrb[14].mxu1 }
 0x272   : > { %v3100_v28 = vadd.f32 %v3099_v58, %v3098_v33  ;;  %v3101_v12 = vpop.f32.mrb[46].mxu0  ;;  %v3002_v55 = vpop.f32.mrb[15].mxu1 }
 0x273   : > { %v1556_v60 = vadd.f32 %v3000_v27, %v4397_v37  ;;  %v3003_v6 = vadd.f32 %v3002_v55, %v3001_v25  ;;  %v3102_v20 = vpop.f32.mrb[47].mxu0 }
 0x274   : > { %v3103_v56 = vadd.f32 %v3102_v20, %v3101_v12  ;;  %3493 = vmatmul.mubr.bf16.gmra.mrb[120].mxu1 %v4332_v34 }
 0x275   : > { %v4430_v18 = vadd.f32 %v3100_v28, %v1556_v60  ;;  %v1559_v22 = vadd.f32 %v3003_v6, %v4397_v37  ;;  %3481 = vmatmul.mubr.bf16.gmra.mrb[152].mxu0 %v4284_v35  ;;  %3496 = vmatprep.mubr.bf16.mxu1 %v4388_v63 }
 0x277   : > { %v4435_v26 = vadd.f32 %v3103_v56, %v1559_v22  ;;  %v3004_v31 = vpop.f32.mrb[16].mxu1 }
 0x278   : > { %v3104_v54 = vpop.f32.mrb[48].mxu0  ;;  %v3005_v1 = vpop.f32.mrb[17].mxu1 }
 0x279   : > { %v3006_v23 = vadd.f32 %v3005_v1, %v3004_v31  ;;  %v3105_v19 = vpop.f32.mrb[49].mxu0  ;;  %v3007_v36 = vpop.f32.mrb[18].mxu1 }
 0x27a   : > { %v3106_v41 = vadd.f32 %v3105_v19, %v3104_v54  ;;  %v3107_v34 = vpop.f32.mrb[50].mxu0  ;;  %v3008_v44 = vpop.f32.mrb[19].mxu1 }
 0x27b   : > { %v1564_v47 = vadd.f32 %v3006_v23, %v4397_v37  ;;  %v3009_v48 = vadd.f32 %v3008_v44, %v3007_v36  ;;  %v3108_v35 = vpop.f32.mrb[51].mxu0 }
 0x27c   : > { %v3109_v50 = vadd.f32 %v3108_v35, %v3107_v34  ;;  %3497 = vmatmul.mubr.bf16.gmra.mrb[124].mxu1 %v913_v46 }
 0x27d   : > { %v4438_v63 = vadd.f32 %v3106_v41, %v1564_v47  ;;  %v1567_v51 = vadd.f32 %v3009_v48, %v4397_v37 }
 0x27f   : > { %v4441_v53 = vadd.f32 %v3109_v50, %v1567_v51  ;;  %v3010_v57 = vpop.f32.mrb[20].mxu1 }
 0x280   : > { %v3110_v62 = vpop.f32.mrb[52].mxu0  ;;  %v3011_v21 = vpop.f32.mrb[21].mxu1 }
 0x281   : > { %v3012_v4 = vadd.f32 %v3011_v21, %v3010_v57  ;;  %v3111_v5 = vpop.f32.mrb[53].mxu0  ;;  %v3013_v7 = vpop.f32.mrb[22].mxu1 }
 0x282   : > { %v3112_v10 = vadd.f32 %v3111_v5, %v3110_v62  ;;  %v3113_v30 = vpop.f32.mrb[54].mxu0  ;;  %v3014_v13 = vpop.f32.mrb[23].mxu1 }
 0x283   : > { %v1572_v14 = vadd.f32 %v3012_v4, %v4397_v37  ;;  %v3015_v15 = vadd.f32 %v3014_v13, %v3013_v7  ;;  %v3114_v16 = vpop.f32.mrb[55].mxu0 }
 0x284   : > { %v3115_v17 = vadd.f32 %v3114_v16, %v3113_v30 }
 0x285   : > { %v4444_v59 = vadd.f32 %v3112_v10, %v1572_v14  ;;  %v1575_v24 = vadd.f32 %v3015_v15, %v4397_v37 }
 0x287   : > { %v4447_v49 = vadd.f32 %v3115_v17, %v1575_v24  ;;  %v3016_v29 = vpop.f32.mrb[24].mxu1 }
 0x288   : > { %v3116_v39 = vpop.f32.mrb[56].mxu0  ;;  %v3017_v40 = vpop.f32.mrb[25].mxu1 }
 0x289   : > { %v3018_v3 = vadd.f32 %v3017_v40, %v3016_v29  ;;  %v3117_v0 = vpop.f32.mrb[57].mxu0  ;;  %v3019_v32 = vpop.f32.mrb[26].mxu1 }
 0x28a   : > { %v3118_v61 = vadd.f32 %v3117_v0, %v3116_v39  ;;  %v3119_v33 = vpop.f32.mrb[58].mxu0  ;;  %v3020_v9 = vpop.f32.mrb[27].mxu1 }
 0x28b   : > { %v1580_v27 = vadd.f32 %v3018_v3, %v4397_v37  ;;  %v3021_v58 = vadd.f32 %v3020_v9, %v3019_v32  ;;  %v3120_v25 = vpop.f32.mrb[59].mxu0 }
 0x28c   : > { %v3121_v28 = vadd.f32 %v3120_v25, %v3119_v33 }
 0x28d   : > { %v4450_v12 = vadd.f32 %v3118_v61, %v1580_v27  ;;  %v1583_v55 = vadd.f32 %v3021_v58, %v4397_v37  ;;  %v3730_v61 = vld [vmem:[#allocation8] sm:$0xff]  }
 0x28e   : > { %3500 = vmatprep.subr.bf16.mxu1 %v3730_v61 }
 0x28f   : > { %v4453_v60 = vadd.f32 %v3121_v28, %v1583_v55  ;;  %v3022_v6 = vpop.f32.mrb[28].mxu1  ;;  %3501 = vmatpush3.bf16.msra.mxu1 %v3730_v61  ;;  %v3731_v55 = vld [vmem:[#allocation8 + $0x8] sm:$0xff]  }
 0x290   : > { %v3122_v20 = vpop.f32.mrb[60].mxu0  ;;  %v3023_v56 = vpop.f32.mrb[29].mxu1  ;;  %3502 = vmatprep.subr.bf16.mxu1 %v3731_v55 }
 0x291   : > { %v3024_v22 = vadd.f32 %v3023_v56, %v3022_v6  ;;  %v3123_v31 = vpop.f32.mrb[61].mxu0  ;;  %v3025_v38 = vpop.f32.mrb[30].mxu1 }
 0x292   : > { %v3124_v52 = vadd.f32 %v3123_v31, %v3122_v20  ;;  %v3125_v54 = vpop.f32.mrb[62].mxu0  ;;  %v3026_v1 = vpop.f32.mrb[31].mxu1 }
 0x293   : > { %v1588_v23 = vadd.f32 %v3024_v22, %v4397_v37  ;;  %v3027_v19 = vadd.f32 %v3026_v1, %v3025_v38  ;;  %v3126_v36 = vpop.f32.mrb[63].mxu0  ;;  %3503 = vmatpush3.bf16.msra.mxu1 %v3731_v55 }
 0x294   : > { %v3127_v41 = vadd.f32 %v3126_v36, %v3125_v54 }
 0x295   : > { %v4456_v34 = vadd.f32 %v3124_v52, %v1588_v23  ;;  %v1591_v44 = vadd.f32 %v3027_v19, %v4397_v37  ;;  %v3732_v19 = vld [vmem:[#allocation8 + $0x10] sm:$0xff]  }
 0x296   : > { %3504 = vmatprep.subr.bf16.mxu1 %v3732_v19 }
 0x297   : > { %v4459_v46 = vadd.f32 %v3127_v41, %v1591_v44  ;;  %v3028_v47 = vpop.f32.mrb[32].mxu1  ;;  %3505 = vmatpush3.bf16.msra.mxu1 %v3732_v19  ;;  %v3737_v19 = vld [vmem:[#allocation8 + $0x38] sm:$0xff]  }
 0x298   : > { %v3128_v48 = vpop.f32.mrb[64].mxu0  ;;  %v3029_v35 = vpop.f32.mrb[33].mxu1 }
 0x299   : > { %v3030_v50 = vadd.f32 %v3029_v35, %v3028_v47  ;;  %v3129_v51 = vpop.f32.mrb[65].mxu0  ;;  %v3031_v57 = vpop.f32.mrb[34].mxu1 }
 0x29a   : > { %v3130_v62 = vadd.f32 %v3129_v51, %v3128_v48  ;;  %v3131_v21 = vpop.f32.mrb[66].mxu0  ;;  %v3032_v4 = vpop.f32.mrb[35].mxu1 }
 0x29b   : > { %v1596_v5 = vadd.f32 %v3030_v50, %v4397_v37  ;;  %v3033_v7 = vadd.f32 %v3032_v4, %v3031_v57  ;;  %v3132_v10 = vpop.f32.mrb[67].mxu0  ;;  %v3733_v50 = vld [vmem:[#allocation8 + $0x18] sm:$0xff]  }
 0x29c   : > { %v3133_v30 = vadd.f32 %v3132_v10, %v3131_v21  ;;  %3506 = vmatprep.subr.bf16.mxu1 %v3733_v50 }
 0x29d   : > { %v4462_v13 = vadd.f32 %v3130_v62, %v1596_v5  ;;  %v1599_v14 = vadd.f32 %v3033_v7, %v4397_v37  ;;  %3507 = vmatpush3.bf16.msra.mxu1 %v3733_v50 }
 0x29f   : > { %v4465_v15 = vadd.f32 %v3133_v30, %v1599_v14  ;;  %v3034_v16 = vpop.f32.mrb[36].mxu1 }
 0x2a0   : > { %v3134_v17 = vpop.f32.mrb[68].mxu0  ;;  %v3035_v24 = vpop.f32.mrb[37].mxu1 }
 0x2a1   : > { %v3036_v29 = vadd.f32 %v3035_v24, %v3034_v16  ;;  %v3135_v39 = vpop.f32.mrb[69].mxu0  ;;  %v3037_v40 = vpop.f32.mrb[38].mxu1  ;;  %v3734_v16 = vld [vmem:[#allocation8 + $0x20] sm:$0xff]  }
 0x2a2   : > { %v3136_v3 = vadd.f32 %v3135_v39, %v3134_v17  ;;  %v3137_v0 = vpop.f32.mrb[70].mxu0  ;;  %v3038_v32 = vpop.f32.mrb[39].mxu1  ;;  %3508 = vmatprep.subr.bf16.mxu1 %v3734_v16 }
 0x2a3   : > { %v1604_v33 = vadd.f32 %v3036_v29, %v4397_v37  ;;  %v3039_v9 = vadd.f32 %v3038_v32, %v3037_v40  ;;  %v3138_v27 = vpop.f32.mrb[71].mxu0  ;;  %3509 = vmatpush3.bf16.msra.mxu1 %v3734_v16 }
 0x2a4   : > { %v3139_v58 = vadd.f32 %v3138_v27, %v3137_v0  ;;  %v3735_v0 = vld [vmem:[#allocation8 + $0x28] sm:$0xff]  }
 0x2a5   : > { %v4468_v25 = vadd.f32 %v3136_v3, %v1604_v33  ;;  %v1607_v28 = vadd.f32 %v3039_v9, %v4397_v37  ;;  %3510 = vmatprep.subr.bf16.mxu1 %v3735_v0 }
 0x2a7   : > { %v4471_v6 = vadd.f32 %v3139_v58, %v1607_v28  ;;  %v3040_v20 = vpop.f32.mrb[40].mxu1  ;;  %3511 = vmatpush3.bf16.msra.mxu1 %v3735_v0 }
 0x2a8   : > { %v3140_v56 = vpop.f32.mrb[72].mxu0  ;;  %v3041_v22 = vpop.f32.mrb[41].mxu1 }
 0x2a9   : > { %v3042_v31 = vadd.f32 %v3041_v22, %v3040_v20  ;;  %v3141_v38 = vpop.f32.mrb[73].mxu0  ;;  %v3043_v52 = vpop.f32.mrb[42].mxu1  ;;  %v3736_v22 = vld [vmem:[#allocation8 + $0x30] sm:$0xff]  }
 0x2aa   : > { %v3142_v54 = vadd.f32 %v3141_v38, %v3140_v56  ;;  %v3143_v1 = vpop.f32.mrb[74].mxu0  ;;  %v3044_v23 = vpop.f32.mrb[43].mxu1  ;;  %3512 = vmatprep.subr.bf16.mxu1 %v3736_v22 }
 0x2ab   : > { %v1612_v36 = vadd.f32 %v3042_v31, %v4397_v37  ;;  %v3045_v41 = vadd.f32 %v3044_v23, %v3043_v52  ;;  %v3144_v44 = vpop.f32.mrb[75].mxu0  ;;  %3513 = vmatpush3.bf16.msra.mxu1 %v3736_v22 }
 0x2ac   : > { %v3145_v47 = vadd.f32 %v3144_v44, %v3143_v1  ;;  %3514 = vmatprep.subr.bf16.mxu1 %v3737_v19 }
 0x2ad   : > { %v4474_v48 = vadd.f32 %v3142_v54, %v1612_v36  ;;  %v1615_v35 = vadd.f32 %v3045_v41, %v4397_v37 }
 0x2af   : > { %v4477_v51 = vadd.f32 %v3145_v47, %v1615_v35  ;;  %v3046_v57 = vpop.f32.mrb[44].mxu1  ;;  %3515 = vmatpush3.bf16.msra.mxu1 %v3737_v19 }
 0x2b0   : > { %v3146_v62 = vpop.f32.mrb[76].mxu0  ;;  %v3047_v21 = vpop.f32.mrb[45].mxu1 }
 0x2b1   : > { %v3048_v4 = vadd.f32 %v3047_v21, %v3046_v57  ;;  %v3147_v5 = vpop.f32.mrb[77].mxu0  ;;  %v3049_v7 = vpop.f32.mrb[46].mxu1 }
 0x2b2   : > { %v3148_v10 = vadd.f32 %v3147_v5, %v3146_v62  ;;  %v3149_v30 = vpop.f32.mrb[78].mxu0  ;;  %v3050_v14 = vpop.f32.mrb[47].mxu1 }
 0x2b3   : > { %v1620_v17 = vadd.f32 %v3048_v4, %v4397_v37  ;;  %v3051_v24 = vadd.f32 %v3050_v14, %v3049_v7  ;;  %v3150_v29 = vpop.f32.mrb[79].mxu0 }
 0x2b4   : > { %v3151_v39 = vadd.f32 %v3150_v29, %v3149_v30 }
 0x2b5   : > { %v4480_v40 = vadd.f32 %v3148_v10, %v1620_v17  ;;  %v1623_v3 = vadd.f32 %v3051_v24, %v4397_v37 }
 0x2b7   : > { %v4483_v32 = vadd.f32 %v3151_v39, %v1623_v3  ;;  %v3052_v61 = vpop.f32.mrb[48].mxu1 }
 0x2b8   : > { %v3152_v33 = vpop.f32.mrb[80].mxu0  ;;  %v3053_v9 = vpop.f32.mrb[49].mxu1 }
 0x2b9   : > { %v3054_v27 = vadd.f32 %v3053_v9, %v3052_v61  ;;  %v3153_v58 = vpop.f32.mrb[81].mxu0  ;;  %v3055_v28 = vpop.f32.mrb[50].mxu1 }
 0x2ba   : > { %v3154_v55 = vadd.f32 %v3153_v58, %v3152_v33  ;;  %v3155_v20 = vpop.f32.mrb[82].mxu0  ;;  %v3056_v56 = vpop.f32.mrb[51].mxu1 }
 0x2bb   : > { %v1628_v31 = vadd.f32 %v3054_v27, %v4397_v37  ;;  %v3057_v38 = vadd.f32 %v3056_v56, %v3055_v28  ;;  %v3156_v52 = vpop.f32.mrb[83].mxu0 }
 0x2bc   : > { %v3157_v54 = vadd.f32 %v3156_v52, %v3155_v20 }
 0x2bd   : > { %v4486_v1 = vadd.f32 %v3154_v55, %v1628_v31  ;;  %v1631_v23 = vadd.f32 %v3057_v38, %v4397_v37 }
 0x2bf   : > { %v4489_v36 = vadd.f32 %v3157_v54, %v1631_v23  ;;  %v3058_v41 = vpop.f32.mrb[52].mxu1 }
 0x2c0   : > { %v3158_v44 = vpop.f32.mrb[84].mxu0  ;;  %v3059_v47 = vpop.f32.mrb[53].mxu1 }
 0x2c1   : > { %v3060_v35 = vadd.f32 %v3059_v47, %v3058_v41  ;;  %v3159_v50 = vpop.f32.mrb[85].mxu0  ;;  %v3061_v57 = vpop.f32.mrb[54].mxu1 }
 0x2c2   : > { %v3160_v62 = vadd.f32 %v3159_v50, %v3158_v44  ;;  %v3161_v21 = vpop.f32.mrb[86].mxu0  ;;  %v3062_v4 = vpop.f32.mrb[55].mxu1 }
 0x2c3   : > { %v1636_v5 = vadd.f32 %v3060_v35, %v4397_v37  ;;  %v3063_v7 = vadd.f32 %v3062_v4, %v3061_v57  ;;  %v3162_v10 = vpop.f32.mrb[87].mxu0 }
 0x2c4   : > { %v3163_v30 = vadd.f32 %v3162_v10, %v3161_v21 }
 0x2c5   : > { %v4492_v14 = vadd.f32 %v3160_v62, %v1636_v5  ;;  %v1639_v16 = vadd.f32 %v3063_v7, %v4397_v37 }
 0x2c7   : > { %v4495_v17 = vadd.f32 %v3163_v30, %v1639_v16  ;;  %v3180_v24 = vpop.f32.mrb[56].mxu1 }
 0x2c8   : > { %v3280_v29 = vpop.f32.mrb[88].mxu0  ;;  %v3181_v39 = vpop.f32.mrb[57].mxu1 }
 0x2c9   : > { %v3182_v3 = vadd.f32 %v3181_v39, %v3180_v24  ;;  %v3281_v0 = vpop.f32.mrb[89].mxu0  ;;  %v3183_v61 = vpop.f32.mrb[58].mxu1 }
 0x2ca   : > { %v3282_v33 = vadd.f32 %v3281_v0, %v3280_v29  ;;  %v3283_v9 = vpop.f32.mrb[90].mxu0  ;;  %v3184_v27 = vpop.f32.mrb[59].mxu1 }
 0x2cb   : > { %v1822_v58 = vadd.f32 %v3182_v3, %v4401_v42  ;;  %v3185_v28 = vadd.f32 %v3184_v27, %v3183_v61  ;;  %v3284_v55 = vpop.f32.mrb[91].mxu0 }
 0x2cc   : > { %v3285_v20 = vadd.f32 %v3284_v55, %v3283_v9 }
 0x2cd   : > { %v1825_v56 = vadd.f32 %v3185_v28, %v4406_v45  ;;  %v4499_v22 = vadd.f32 %v3282_v33, %v1822_v58 }
 0x2cf   : > { %v3186_v37 = vpop.f32.mrb[60].mxu1  ;;  %v4501_v31 = vadd.f32 %v3285_v20, %v1825_v56 }
 0x2d0   : > { %v3286_v38 = vpop.f32.mrb[92].mxu0  ;;  %v3187_v52 = vpop.f32.mrb[61].mxu1 }
 0x2d1   : > { %v3188_v54 = vadd.f32 %v3187_v52, %v3186_v37  ;;  %v3287_v23 = vpop.f32.mrb[93].mxu0  ;;  %v3189_v19 = vpop.f32.mrb[62].mxu1 }
 0x2d2   : > { %v3288_v41 = vadd.f32 %v3287_v23, %v3286_v38  ;;  %v3289_v44 = vpop.f32.mrb[94].mxu0  ;;  %v3190_v47 = vpop.f32.mrb[63].mxu1 }
 0x2d3   : > { %v1830_v42 = vadd.f32 %v3188_v54, %v4410_v43  ;;  %v3191_v35 = vadd.f32 %v3190_v47, %v3189_v19  ;;  %v3290_v50 = vpop.f32.mrb[95].mxu0 }
 0x2d4   : > { %v3291_v57 = vadd.f32 %v3290_v50, %v3289_v44 }
 0x2d5   : > { %v1833_v45 = vadd.f32 %v3191_v35, %v4416_v11  ;;  %v4505_v62 = vadd.f32 %v3288_v41, %v1830_v42 }
 0x2d7   : > { %v3192_v21 = vpop.f32.mrb[64].mxu1  ;;  %v4507_v4 = vadd.f32 %v3291_v57, %v1833_v45 }
 0x2d8   : > { %v3292_v5 = vpop.f32.mrb[96].mxu0  ;;  %v3193_v7 = vpop.f32.mrb[65].mxu1 }
 0x2d9   : > { %v3194_v10 = vadd.f32 %v3193_v7, %v3192_v21  ;;  %v3293_v30 = vpop.f32.mrb[97].mxu0  ;;  %v3195_v16 = vpop.f32.mrb[66].mxu1 }
 0x2da   : > { %v3294_v24 = vadd.f32 %v3293_v30, %v3292_v5  ;;  %v3295_v29 = vpop.f32.mrb[98].mxu0  ;;  %v3196_v39 = vpop.f32.mrb[67].mxu1 }
 0x2db   : > { %v1838_v43 = vadd.f32 %v3194_v10, %v4420_v2  ;;  %v3197_v3 = vadd.f32 %v3196_v39, %v3195_v16  ;;  %v3296_v0 = vpop.f32.mrb[99].mxu0 }
 0x2dc   : > { %v3297_v61 = vadd.f32 %v3296_v0, %v3295_v29 }
 0x2dd   : > { %v1841_v11 = vadd.f32 %v3197_v3, %v4426_v8  ;;  %v4511_v33 = vadd.f32 %v3294_v24, %v1838_v43 }
 0x2df   : > { %v3198_v9 = vpop.f32.mrb[68].mxu1  ;;  %v4513_v27 = vadd.f32 %v3297_v61, %v1841_v11 }
 0x2e0   : > { %v3298_v58 = vpop.f32.mrb[100].mxu0  ;;  %v3199_v28 = vpop.f32.mrb[69].mxu1 }
 0x2e1   : > { %v3200_v55 = vadd.f32 %v3199_v28, %v3198_v9  ;;  %v3299_v20 = vpop.f32.mrb[101].mxu0  ;;  %v3201_v56 = vpop.f32.mrb[70].mxu1 }
 0x2e2   : > { %v3300_v37 = vadd.f32 %v3299_v20, %v3298_v58  ;;  %v3301_v38 = vpop.f32.mrb[102].mxu0  ;;  %v3202_v52 = vpop.f32.mrb[71].mxu1 }
 0x2e3   : > { %v1846_v2 = vadd.f32 %v3200_v55, %v4430_v18  ;;  %v3203_v54 = vadd.f32 %v3202_v52, %v3201_v56  ;;  %v3302_v23 = vpop.f32.mrb[103].mxu0 }
 0x2e4   : > { %v3303_v19 = vadd.f32 %v3302_v23, %v3301_v38 }
 0x2e5   : > { %v1849_v8 = vadd.f32 %v3203_v54, %v4435_v26  ;;  %v4517_v41 = vadd.f32 %v3300_v37, %v1846_v2 }
 0x2e7   : > { %v3204_v44 = vpop.f32.mrb[72].mxu1  ;;  %v4519_v47 = vadd.f32 %v3303_v19, %v1849_v8 }
 0x2e8   : > { %v3304_v42 = vpop.f32.mrb[104].mxu0  ;;  %v3205_v35 = vpop.f32.mrb[73].mxu1 }
 0x2e9   : > { %v3206_v50 = vadd.f32 %v3205_v35, %v3204_v44  ;;  %v3305_v57 = vpop.f32.mrb[105].mxu0  ;;  %v3207_v45 = vpop.f32.mrb[74].mxu1 }
 0x2ea   : > { %v3306_v21 = vadd.f32 %v3305_v57, %v3304_v42  ;;  %v3307_v5 = vpop.f32.mrb[106].mxu0  ;;  %v3208_v7 = vpop.f32.mrb[75].mxu1 }
 0x2eb   : > { %v1854_v18 = vadd.f32 %v3206_v50, %v4438_v63  ;;  %v3209_v10 = vadd.f32 %v3208_v7, %v3207_v45  ;;  %v3308_v30 = vpop.f32.mrb[107].mxu0 }
 0x2ec   : > { %v3309_v16 = vadd.f32 %v3308_v30, %v3307_v5 }
 0x2ed   : > { %v1857_v26 = vadd.f32 %v3209_v10, %v4441_v53  ;;  %v4523_v24 = vadd.f32 %v3306_v21, %v1854_v18 }
 0x2ef   : > { %v3210_v29 = vpop.f32.mrb[76].mxu1  ;;  %v4525_v39 = vadd.f32 %v3309_v16, %v1857_v26 }
 0x2f0   : > { %v3310_v43 = vpop.f32.mrb[108].mxu0  ;;  %v3211_v3 = vpop.f32.mrb[77].mxu1 }
 0x2f1   : > { %v3212_v0 = vadd.f32 %v3211_v3, %v3210_v29  ;;  %v3311_v61 = vpop.f32.mrb[109].mxu0  ;;  %v3213_v11 = vpop.f32.mrb[78].mxu1 }
 0x2f2   : > { %v3312_v9 = vadd.f32 %v3311_v61, %v3310_v43  ;;  %v3313_v58 = vpop.f32.mrb[110].mxu0  ;;  %v3214_v28 = vpop.f32.mrb[79].mxu1 }
 0x2f3   : > { %v1862_v63 = vadd.f32 %v3212_v0, %v4444_v59  ;;  %v3215_v55 = vadd.f32 %v3214_v28, %v3213_v11  ;;  %v3314_v20 = vpop.f32.mrb[111].mxu0 }
 0x2f4   : > { %v3315_v56 = vadd.f32 %v3314_v20, %v3313_v58 }
 0x2f5   : > { %v1865_v53 = vadd.f32 %v3215_v55, %v4447_v49  ;;  %v4529_v37 = vadd.f32 %v3312_v9, %v1862_v63 }
 0x2f7   : > { %v3216_v38 = vpop.f32.mrb[80].mxu1  ;;  %v4531_v52 = vadd.f32 %v3315_v56, %v1865_v53 }
 0x2f8   : > { %v3316_v2 = vpop.f32.mrb[112].mxu0  ;;  %v3217_v54 = vpop.f32.mrb[81].mxu1 }
 0x2f9   : > { %v3218_v23 = vadd.f32 %v3217_v54, %v3216_v38  ;;  %v3317_v19 = vpop.f32.mrb[113].mxu0  ;;  %v3219_v8 = vpop.f32.mrb[82].mxu1 }
 0x2fa   : > { %v3318_v44 = vadd.f32 %v3317_v19, %v3316_v2  ;;  %v3319_v42 = vpop.f32.mrb[114].mxu0  ;;  %v3220_v35 = vpop.f32.mrb[83].mxu1 }
 0x2fb   : > { %v1870_v59 = vadd.f32 %v3218_v23, %v4450_v12  ;;  %v3221_v50 = vadd.f32 %v3220_v35, %v3219_v8  ;;  %v3320_v57 = vpop.f32.mrb[115].mxu0 }
 0x2fc   : > { %v3321_v45 = vadd.f32 %v3320_v57, %v3319_v42 }
 0x2fd   : > { %v1873_v49 = vadd.f32 %v3221_v50, %v4453_v60  ;;  %v4535_v21 = vadd.f32 %v3318_v44, %v1870_v59 }
 0x2ff   : > { %v3222_v5 = vpop.f32.mrb[84].mxu1  ;;  %v4537_v7 = vadd.f32 %v3321_v45, %v1873_v49 }
 0x300   : > { %v3322_v18 = vpop.f32.mrb[116].mxu0  ;;  %v3223_v10 = vpop.f32.mrb[85].mxu1 }
 0x301   : > { %v3224_v30 = vadd.f32 %v3223_v10, %v3222_v5  ;;  %v3323_v16 = vpop.f32.mrb[117].mxu0  ;;  %v3225_v26 = vpop.f32.mrb[86].mxu1 }
 0x302   : > { %v3324_v29 = vadd.f32 %v3323_v16, %v3322_v18  ;;  %v3325_v43 = vpop.f32.mrb[118].mxu0  ;;  %v3226_v3 = vpop.f32.mrb[87].mxu1 }
 0x303   : > { %v1878_v12 = vadd.f32 %v3224_v30, %v4456_v34  ;;  %v3227_v0 = vadd.f32 %v3226_v3, %v3225_v26  ;;  %v3326_v61 = vpop.f32.mrb[119].mxu0 }
 0x304   : > { %v3327_v11 = vadd.f32 %v3326_v61, %v3325_v43 }
 0x305   : > { %v1881_v60 = vadd.f32 %v3227_v0, %v4459_v46  ;;  %v4541_v9 = vadd.f32 %v3324_v29, %v1878_v12 }
 0x307   : > { %v3228_v58 = vpop.f32.mrb[88].mxu1  ;;  %v4543_v28 = vadd.f32 %v3327_v11, %v1881_v60 }
 0x308   : > { %v3328_v63 = vpop.f32.mrb[120].mxu0  ;;  %v3229_v55 = vpop.f32.mrb[89].mxu1 }
 0x309   : > { %v3230_v20 = vadd.f32 %v3229_v55, %v3228_v58  ;;  %v3329_v56 = vpop.f32.mrb[121].mxu0  ;;  %v3231_v53 = vpop.f32.mrb[90].mxu1 }
 0x30a   : > { %v3330_v38 = vadd.f32 %v3329_v56, %v3328_v63  ;;  %v3331_v2 = vpop.f32.mrb[122].mxu0  ;;  %v3232_v54 = vpop.f32.mrb[91].mxu1 }
 0x30b   : > { %v1886_v34 = vadd.f32 %v3230_v20, %v4462_v13  ;;  %v3233_v23 = vadd.f32 %v3232_v54, %v3231_v53  ;;  %v3332_v19 = vpop.f32.mrb[123].mxu0 }
 0x30c   : > { %v3333_v8 = vadd.f32 %v3332_v19, %v3331_v2 }
 0x30d   : > { %v1889_v46 = vadd.f32 %v3233_v23, %v4465_v15  ;;  %v4547_v44 = vadd.f32 %v3330_v38, %v1886_v34 }
 0x30f   : > { %v3234_v42 = vpop.f32.mrb[92].mxu1  ;;  %v4549_v35 = vadd.f32 %v3333_v8, %v1889_v46 }
 0x310   : > { %v3334_v59 = vpop.f32.mrb[124].mxu0  ;;  %v3235_v50 = vpop.f32.mrb[93].mxu1 }
 0x311   : > { %v3236_v57 = vadd.f32 %v3235_v50, %v3234_v42  ;;  %v3335_v45 = vpop.f32.mrb[125].mxu0  ;;  %v3237_v49 = vpop.f32.mrb[94].mxu1 }
 0x312   : > { %v3336_v5 = vadd.f32 %v3335_v45, %v3334_v59  ;;  %v3337_v18 = vpop.f32.mrb[126].mxu0  ;;  %v3238_v10 = vpop.f32.mrb[95].mxu1 }
 0x313   : > { %v1894_v13 = vadd.f32 %v3236_v57, %v4468_v25  ;;  %v3239_v30 = vadd.f32 %v3238_v10, %v3237_v49  ;;  %v3338_v16 = vpop.f32.mrb[127].mxu0 }
 0x314   : > { %v3339_v26 = vadd.f32 %v3338_v16, %v3337_v18 }
 0x315   : > { %v1897_v15 = vadd.f32 %v3239_v30, %v4471_v6  ;;  %v4553_v29 = vadd.f32 %v3336_v5, %v1894_v13 }
 0x317   : > { %v3240_v43 = vpop.f32.mrb[96].mxu1  ;;  %v4555_v3 = vadd.f32 %v3339_v26, %v1897_v15 }
 0x318   : > { %v3340_v12 = vpop.f32.mrb[128].mxu0  ;;  %v3241_v0 = vpop.f32.mrb[97].mxu1 }
 0x319   : > { %v3242_v61 = vadd.f32 %v3241_v0, %v3240_v43  ;;  %v3341_v11 = vpop.f32.mrb[129].mxu0  ;;  %v3243_v60 = vpop.f32.mrb[98].mxu1 }
 0x31a   : > { %v3342_v58 = vadd.f32 %v3341_v11, %v3340_v12  ;;  %v3343_v63 = vpop.f32.mrb[130].mxu0  ;;  %v3244_v55 = vpop.f32.mrb[99].mxu1 }
 0x31b   : > { %v1902_v25 = vadd.f32 %v3242_v61, %v4474_v48  ;;  %v3245_v20 = vadd.f32 %v3244_v55, %v3243_v60  ;;  %v3344_v56 = vpop.f32.mrb[131].mxu0 }
 0x31c   : > { %v3345_v53 = vadd.f32 %v3344_v56, %v3343_v63 }
 0x31d   : > { %v1905_v6 = vadd.f32 %v3245_v20, %v4477_v51  ;;  %v4559_v38 = vadd.f32 %v3342_v58, %v1902_v25 }
 0x31f   : > { %v3246_v2 = vpop.f32.mrb[100].mxu1  ;;  %v4561_v54 = vadd.f32 %v3345_v53, %v1905_v6 }
 0x320   : > { %v3346_v34 = vpop.f32.mrb[132].mxu0  ;;  %v3247_v23 = vpop.f32.mrb[101].mxu1 }
 0x321   : > { %v3248_v19 = vadd.f32 %v3247_v23, %v3246_v2  ;;  %v3347_v8 = vpop.f32.mrb[133].mxu0  ;;  %v3249_v46 = vpop.f32.mrb[102].mxu1 }
 0x322   : > { %v3348_v42 = vadd.f32 %v3347_v8, %v3346_v34  ;;  %v3349_v59 = vpop.f32.mrb[134].mxu0  ;;  %v3250_v50 = vpop.f32.mrb[103].mxu1 }
 0x323   : > { %v1910_v48 = vadd.f32 %v3248_v19, %v4480_v40  ;;  %v3251_v57 = vadd.f32 %v3250_v50, %v3249_v46  ;;  %v3350_v45 = vpop.f32.mrb[135].mxu0 }
 0x324   : > { %v3351_v49 = vadd.f32 %v3350_v45, %v3349_v59 }
 0x325   : > { %v1913_v51 = vadd.f32 %v3251_v57, %v4483_v32  ;;  %v4565_v5 = vadd.f32 %v3348_v42, %v1910_v48 }
 0x327   : > { %v3252_v18 = vpop.f32.mrb[104].mxu1  ;;  %v4567_v10 = vadd.f32 %v3351_v49, %v1913_v51 }
 0x328   : > { %v3352_v13 = vpop.f32.mrb[136].mxu0  ;;  %v3253_v30 = vpop.f32.mrb[105].mxu1 }
 0x329   : > { %v3254_v16 = vadd.f32 %v3253_v30, %v3252_v18  ;;  %v3353_v26 = vpop.f32.mrb[137].mxu0  ;;  %v3255_v15 = vpop.f32.mrb[106].mxu1 }
 0x32a   : > { %v3354_v43 = vadd.f32 %v3353_v26, %v3352_v13  ;;  %v3355_v12 = vpop.f32.mrb[138].mxu0  ;;  %v3256_v0 = vpop.f32.mrb[107].mxu1 }
 0x32b   : > { %v1918_v40 = vadd.f32 %v3254_v16, %v4486_v1  ;;  %v3257_v61 = vadd.f32 %v3256_v0, %v3255_v15  ;;  %v3356_v11 = vpop.f32.mrb[139].mxu0 }
 0x32c   : > { %v3357_v60 = vadd.f32 %v3356_v11, %v3355_v12 }
 0x32d   : > { %v1921_v32 = vadd.f32 %v3257_v61, %v4489_v36  ;;  %v4571_v58 = vadd.f32 %v3354_v43, %v1918_v40 }
 0x32f   : > { %v3258_v63 = vpop.f32.mrb[108].mxu1  ;;  %v4573_v55 = vadd.f32 %v3357_v60, %v1921_v32 }
 0x330   : > { %v3358_v25 = vpop.f32.mrb[140].mxu0  ;;  %v3259_v20 = vpop.f32.mrb[109].mxu1 }
 0x331   : > { %v3260_v56 = vadd.f32 %v3259_v20, %v3258_v63  ;;  %v3359_v53 = vpop.f32.mrb[141].mxu0  ;;  %v3261_v6 = vpop.f32.mrb[110].mxu1 }
 0x332   : > { %v3360_v2 = vadd.f32 %v3359_v53, %v3358_v25  ;;  %v3361_v34 = vpop.f32.mrb[142].mxu0  ;;  %v3262_v23 = vpop.f32.mrb[111].mxu1 }
 0x333   : > { %v1926_v1 = vadd.f32 %v3260_v56, %v4492_v14  ;;  %v3263_v19 = vadd.f32 %v3262_v23, %v3261_v6  ;;  %v3362_v8 = vpop.f32.mrb[143].mxu0 }
 0x334   : > { %v3363_v46 = vadd.f32 %v3362_v8, %v3361_v34 }
 0x335   : > { %v1929_v36 = vadd.f32 %v3263_v19, %v4495_v17  ;;  %v4577_v42 = vadd.f32 %v3360_v2, %v1926_v1 }
 0x337   : > { %v3486_v59 = vpop.f32.mrb[112].mxu1  ;;  %v4579_v50 = vadd.f32 %v3363_v46, %v1929_v36 }
 0x338   : > { %v3474_v48 = vpop.f32.mrb[144].mxu0  ;;  %v2168_v57 = vadd.f32 %v3486_v59, %v4541_v9  ;;  %v2159_v45 = vpop.f32.mrb[113].mxu1 }
 0x339   : > { %v2120_v49 = vadd.f32 %v3474_v48, %v4505_v62  ;;  %v2111_v51 = vpop.f32.mrb[145].mxu0  ;;  %v2160_v18 = vadd.f32 %v2159_v45, %v4535_v21  ;;  %v3487_v14 = vpop.f32.mrb[114].mxu1 }
 0x33a   : > { %v2112_v13 = vadd.f32 %v2111_v51, %v4499_v22  ;;  %v3475_v30 = vpop.f32.mrb[146].mxu0  ;;  %v2171_v17 = vadd.f32 %v3487_v14, %v4543_v28  ;;  %v2162_v16 = vpop.f32.mrb[115].mxu1  ;;  %v2236_v12 = vmax.f32 %v2168_v57, 0.0 }
 0x33b   : > { %v2123_v26 = vadd.f32 %v3475_v30, %v4507_v4  ;;  %v2114_v15 = vpop.f32.mrb[147].mxu0  ;;  %v2163_v43 = vadd.f32 %v2162_v16, %v4537_v7  ;;  %v2224_v62 = vmax.f32 %v2120_v49, 0.0  ;;  %v2234_v40 = vmax.f32 %v2160_v18, 0.0 }
 0x33c   : > { %v2237_v9 = vmax.f32 %v2171_v17, 0.0  ;;  %v2115_v0 = vadd.f32 %v2114_v15, %v4501_v31  ;;  %v2222_v11 = vmax.f32 %v2112_v13, 0.0 }
 0x33d   : > { %v2225_v61 = vmax.f32 %v2123_v26, 0.0  ;;  %v2235_v21 = vmax.f32 %v2163_v43, 0.0 }
 0x33e   : > { %v4589_v60 = vpack.c.bf16 %v2237_v9, %v2236_v12  ;;  %v2223_v22 = vmax.f32 %v2115_v0, 0.0 }
 0x33f   : > { %v2308_v32 = vpack.c.bf16 %v2225_v61, %v2224_v62  ;;  %v4591_v28 = vpack.c.bf16 %v2235_v21, %v2234_v40  ;;  %v3490_v63 = vpop.f32.mrb[116].mxu1 }
 0x340   : > { %v2307_v4 = vpack.c.bf16 %v2223_v22, %v2222_v11  ;;  %v3478_v25 = vpop.f32.mrb[148].mxu0  ;;  %v2184_v7 = vadd.f32 %v3490_v63, %v4553_v29  ;;  %v2175_v20 = vpop.f32.mrb[117].mxu1 }
 0x341   : > { %v2136_v56 = vadd.f32 %v3478_v25, %v4517_v41  ;;  %v2127_v31 = vpop.f32.mrb[149].mxu0  ;;  %v2176_v53 = vadd.f32 %v2175_v20, %v4547_v44  ;;  %v3491_v6 = vpop.f32.mrb[118].mxu1 }
 0x342   : > { %v2128_v2 = vadd.f32 %v2127_v31, %v4511_v33  ;;  %v3479_v34 = vpop.f32.mrb[150].mxu0  ;;  %v2187_v23 = vadd.f32 %v3491_v6, %v4555_v3  ;;  %3516 = vmatprep.mubr.bf16.mxu1 %v2307_v4  ;;  %v2178_v1 = vpop.f32.mrb[119].mxu1  ;;  %v2240_v29 = vmax.f32 %v2184_v7, 0.0 }
 0x343   : > { %v2139_v19 = vadd.f32 %v3479_v34, %v4519_v47  ;;  %v2130_v8 = vpop.f32.mrb[151].mxu0  ;;  %v2179_v46 = vadd.f32 %v2178_v1, %v4549_v35  ;;  %3517 = vmatmul.mubr.bf16.vlgmr.msra.gmra.mrb[128].mxu1 %v2308_v32  ;;  %v2228_v59 = vmax.f32 %v2136_v56, 0.0  ;;  %v2238_v44 = vmax.f32 %v2176_v53, 0.0 }
 0x344   : > { %v2241_v36 = vmax.f32 %v2187_v23, 0.0  ;;  %v2131_v41 = vadd.f32 %v2130_v8, %v4513_v27  ;;  %v2226_v33 = vmax.f32 %v2128_v2, 0.0 }
 0x345   : > { %v2229_v48 = vmax.f32 %v2139_v19, 0.0  ;;  %v2239_v57 = vmax.f32 %v2179_v46, 0.0 }
 0x346   : > { %v2316_v45 = vpack.c.bf16 %v2241_v36, %v2240_v29  ;;  %v2227_v49 = vmax.f32 %v2131_v41, 0.0 }
 0x347   : > { %v2310_v3 = vpack.c.bf16 %v2229_v48, %v2228_v59  ;;  %v2315_v51 = vpack.c.bf16 %v2239_v57, %v2238_v44  ;;  %v3494_v18 = vpop.f32.mrb[120].mxu1 }
 0x348   : > { %v2309_v14 = vpack.c.bf16 %v2227_v49, %v2226_v33  ;;  %v3482_v47 = vpop.f32.mrb[152].mxu0  ;;  %v2200_v13 = vadd.f32 %v3494_v18, %v4565_v5  ;;  %v2191_v35 = vpop.f32.mrb[121].mxu1 }
 0x349   : > { %v2152_v30 = vadd.f32 %v3482_v47, %v4529_v37  ;;  %v2143_v17 = vpop.f32.mrb[153].mxu0  ;;  %v2192_v27 = vadd.f32 %v2191_v35, %v4559_v38  ;;  %v3495_v16 = vpop.f32.mrb[122].mxu1 }
 0x34a   : > { %v2144_v26 = vadd.f32 %v2143_v17, %v4523_v24  ;;  %v3483_v15 = vpop.f32.mrb[154].mxu0  ;;  %v2203_v43 = vadd.f32 %v3495_v16, %v4567_v10  ;;  %3520 = vmatprep.mubr.bf16.mxu1 %v2309_v14  ;;  %v2194_v12 = vpop.f32.mrb[123].mxu1  ;;  %v2244_v5 = vmax.f32 %v2200_v13, 0.0 }
 0x34b   : > { %v2155_v9 = vadd.f32 %v3483_v15, %v4531_v52  ;;  %v2146_v0 = vpop.f32.mrb[155].mxu0  ;;  %v2195_v62 = vadd.f32 %v2194_v12, %v4561_v54  ;;  %3521 = vmatmul.mubr.bf16.gmra.mrb[132].mxu1 %v2310_v3  ;;  %v2232_v61 = vmax.f32 %v2152_v30, 0.0  ;;  %v2242_v38 = vmax.f32 %v2192_v27, 0.0 }
 0x34c   : > { %v2245_v40 = vmax.f32 %v2203_v43, 0.0  ;;  %v2147_v37 = vadd.f32 %v2146_v0, %v4525_v39  ;;  %v2230_v24 = vmax.f32 %v2144_v26, 0.0 }
 0x34d   : > { %v2233_v21 = vmax.f32 %v2155_v9, 0.0  ;;  %v2243_v11 = vmax.f32 %v2195_v62, 0.0 }
 0x34e   : > { %v2318_v22 = vpack.c.bf16 %v2245_v40, %v2244_v5  ;;  %v2231_v32 = vmax.f32 %v2147_v37, 0.0  ;;  %v2931_v37 = vld [vmem:[%s4132_s23 + $0x30] sm:$0xff]  }
 0x34f   : > { %v2312_v10 = vpack.c.bf16 %v2233_v21, %v2232_v61  ;;  %v2317_v63 = vpack.c.bf16 %v2243_v11, %v2242_v38  ;;  %v3498_v4 = vpop.f32.mrb[124].mxu1  ;;  %v2930_v21 = vld [vmem:[%s4132_s23 + $0x28] sm:$0xff]  }
 0x350   : > { %v2311_v25 = vpack.c.bf16 %v2231_v32, %v2230_v24  ;;  %v2216_v52 = vadd.f32 %v3498_v4, %v4577_v42  ;;  %v2207_v7 = vpop.f32.mrb[125].mxu1  ;;  %v2892_v32 = vunpack.c.l.bf16 %v2931_v37  ;;  %v2888_v4 = vunpack.c.l.bf16 %v2930_v21 }
 0x351   : > { %v2208_v54 = vadd.f32 %v2207_v7, %v4571_v58  ;;  %v3499_v20 = vpop.f32.mrb[126].mxu1  ;;  %v2893_v7 = vunpack.c.h.bf16 %v2931_v37 }
 0x352   : > { %v2219_v56 = vadd.f32 %v3499_v20, %v4579_v50  ;;  %3524 = vmatprep.mubr.bf16.mxu1 %v2311_v25  ;;  %v2210_v39 = vpop.f32.mrb[127].mxu1  ;;  %v2248_v53 = vmax.f32 %v2216_v52, 0.0  ;;  %v2926_v50 = vld [vmem:[%s4132_s23 + $0x8] sm:$0xff]  }
 0x353   : > { %v2211_v31 = vadd.f32 %v2210_v39, %v4573_v55  ;;  %3525 = vmatmul.mubr.bf16.gmra.mrb[136].mxu1 %v2312_v10  ;;  %v2246_v42 = vmax.f32 %v2208_v54, 0.0  ;;  %v2927_v55 = vld [vmem:[%s4132_s23 + $0x10] sm:$0xff]   ;;  %v2873_v41 = vunpack.c.h.bf16 %v2926_v50 }
 0x354   : > { %v2249_v6 = vmax.f32 %v2219_v56, 0.0  ;;  %3528 = vmatprep.mubr.bf16.mxu1 %v4591_v28  ;;  %v4622_v28 = vld [vmem:[%s4716_s6] ss:$0 sm:$0xff]  ;;  %v2876_v23 = vunpack.c.l.bf16 %v2927_v55  ;;  %v2877_v46 = vunpack.c.h.bf16 %v2927_v55  ;;  %v2889_v56 = vunpack.c.h.bf16 %v2930_v21  ;;  %v2932_v55 = vld [vmem:[%s4132_s23 + $0x38] sm:$0xff]   ;;  %v2937_v21 = vld [vmem:[%s4132_s23 + $0x60] sm:$0xff]  }
 0x355   : > { %v2247_v2 = vmax.f32 %v2211_v31, 0.0 }
 0x356   : > { %v2320_v34 = vpack.c.bf16 %v2249_v6, %v2248_v53 }
 0x357   : > { %v2319_v58 = vpack.c.bf16 %v2247_v2, %v2246_v42  ;;  %v2933_v2 = vld [vmem:[%s4132_s23 + $0x40] sm:$0xff]  }
 0x35b   : > { %3529 = vmatmul.mubr.bf16.gmra.mrb[140].mxu1 %v4589_v60  ;;  %v2872_v60 = vunpack.c.l.bf16 %v2926_v50 }
 0x35c   : > { %3532 = vmatprep.mubr.bf16.mxu1 %v2315_v51  ;;  %v2928_v51 = vld [vmem:[%s4132_s23 + $0x18] sm:$0xff]  }
 0x35d   : > { %v2880_v17 = vunpack.c.l.bf16 %v2928_v51  ;;  %v2881_v12 = vunpack.c.h.bf16 %v2928_v51  ;;  %v2935_v51 = vld [vmem:[%s4132_s23 + $0x50] sm:$0xff]  }
 0x363   : > { %3533 = vmatmul.mubr.bf16.gmra.mrb[144].mxu1 %v2316_v45  ;;  %v2929_v45 = vld [vmem:[%s4132_s23 + $0x20] sm:$0xff]  }
 0x364   : > { %3536 = vmatprep.mubr.bf16.mxu1 %v2317_v63  ;;  %v2884_v13 = vunpack.c.l.bf16 %v2929_v45  ;;  %v2885_v26 = vunpack.c.h.bf16 %v2929_v45 }
 0x36b   : > { %3537 = vmatmul.mubr.bf16.gmra.mrb[148].mxu1 %v2318_v22 }
 0x36c   : > { %3540 = vmatprep.mubr.bf16.mxu1 %v2319_v58 }
 0x373   : > { %3541 = vmatmul.mubr.bf16.gmra.mrb[152].mxu1 %v2320_v34 }
 0x416   : > { %v3518_v1 = vpop.f32.mrb[128].mxu1 }
 0x417   : > { %v2435_v19 = vadd.f32 %v3518_v1, %v4622_v28  ;;  %v2426_v8 = vpop.f32.mrb[129].mxu1 }
 0x418   : > { %v2427_v29 = vadd.f32 %v4622_v28, %v2426_v8  ;;  %v3519_v36 = vpop.f32.mrb[130].mxu1 }
 0x419   : > { %v2539_v59 = vadd.f32 %v2876_v23, %v2435_v19  ;;  %v2438_v44 = vadd.f32 %v3519_v36, %v4622_v28  ;;  %v2429_v48 = vpop.f32.mrb[131].mxu1 }
 0x41a   : > { %v2537_v57 = vadd.f32 %v2872_v60, %v2427_v29  ;;  %v2430_v33 = vadd.f32 %v4622_v28, %v2429_v48  ;;  %v2900_v60 = vunpack.c.l.bf16 %v2933_v2  ;;  %v2897_v48 = vunpack.c.h.bf16 %v2932_v55 }
 0x41b   : > { %v2567_v49 = vmax.f32 %v2539_v59, 0.0  ;;  %v2540_v3 = vadd.f32 %v2877_v46, %v2438_v44  ;;  %v2896_v46 = vunpack.c.l.bf16 %v2932_v55  ;;  %v2939_v55 = vld [vmem:[%s4132_s23 + $0x70] sm:$0xff]  }
 0x41c   : > { %v2565_v18 = vmax.f32 %v2537_v57, 0.0  ;;  %v2538_v14 = vadd.f32 %v2873_v41, %v2430_v33  ;;  %v2901_v41 = vunpack.c.h.bf16 %v2933_v2 }
 0x41d   : > { %2595 = vst [vmem:[%s4630_s16 + $0xf] sm:$0xfe] %v2567_v49  ;;  %v2568_v47 = vmax.f32 %v2540_v3, 0.0 }
 0x41e   : > { %2593 = vst [vmem:[%s4630_s16 - $0x1] sm:$0xfe] %v2565_v18  ;;  %v2566_v35 = vmax.f32 %v2538_v14, 0.0  ;;  %v3522_v30 = vpop.f32.mrb[132].mxu1 }
 0x41f   : > { %2596 = vst [vmem:[%s4630_s16 + $0x17] sm:$0x7f] %v2568_v47  ;;  %v2451_v27 = vadd.f32 %v3522_v30, %v4622_v28  ;;  %v2442_v16 = vpop.f32.mrb[133].mxu1  ;;  %v2934_v47 = vld [vmem:[%s4132_s23 + $0x48] sm:$0xff]  }
 0x420   : > { %2594 = vst [vmem:[%s4630_s16 + $0x7] sm:$0x7f] %v2566_v35  ;;  %v2443_v15 = vadd.f32 %v4622_v28, %v2442_v16  ;;  %v3523_v43 = vpop.f32.mrb[134].mxu1 }
 0x421   : > { %v2543_v9 = vadd.f32 %v2884_v13, %v2451_v27  ;;  %v2454_v0 = vadd.f32 %v3523_v43, %v4622_v28  ;;  %v2445_v62 = vpop.f32.mrb[135].mxu1 }
 0x422   : > { %v2541_v5 = vadd.f32 %v2880_v17, %v2443_v15  ;;  %v2446_v40 = vadd.f32 %v4622_v28, %v2445_v62  ;;  %v2908_v17 = vunpack.c.l.bf16 %v2935_v51  ;;  %v2905_v62 = vunpack.c.h.bf16 %v2934_v47 }
 0x423   : > { %v2571_v61 = vmax.f32 %v2543_v9, 0.0  ;;  %v2544_v38 = vadd.f32 %v2885_v26, %v2454_v0  ;;  %v2904_v26 = vunpack.c.l.bf16 %v2934_v47 }
 0x424   : > { %v2569_v11 = vmax.f32 %v2541_v5, 0.0  ;;  %v2542_v24 = vadd.f32 %v2881_v12, %v2446_v40  ;;  %v2909_v12 = vunpack.c.h.bf16 %v2935_v51 }
 0x425   : > { %2599 = vst [vmem:[%s4630_s16 + $0x2f] sm:$0xfe] %v2571_v61  ;;  %v2572_v22 = vmax.f32 %v2544_v38, 0.0 }
 0x426   : > { %2597 = vst [vmem:[%s4630_s16 + $0x1f] sm:$0xfe] %v2569_v11  ;;  %v2570_v10 = vmax.f32 %v2542_v24, 0.0  ;;  %v3526_v63 = vpop.f32.mrb[136].mxu1 }
 0x427   : > { %2600 = vst [vmem:[%s4630_s16 + $0x37] sm:$0x7f] %v2572_v22  ;;  %v2467_v25 = vadd.f32 %v3526_v63, %v4622_v28  ;;  %v2458_v52 = vpop.f32.mrb[137].mxu1  ;;  %v2936_v22 = vld [vmem:[%s4132_s23 + $0x58] sm:$0xff]  }
 0x428   : > { %2598 = vst [vmem:[%s4630_s16 + $0x27] sm:$0x7f] %v2570_v10  ;;  %v2459_v54 = vadd.f32 %v4622_v28, %v2458_v52  ;;  %v3527_v20 = vpop.f32.mrb[138].mxu1 }
 0x429   : > { %v2547_v39 = vadd.f32 %v2892_v32, %v2467_v25  ;;  %v2470_v31 = vadd.f32 %v3527_v20, %v4622_v28  ;;  %v2461_v53 = vpop.f32.mrb[139].mxu1 }
 0x42a   : > { %v2545_v6 = vadd.f32 %v2888_v4, %v2459_v54  ;;  %v2462_v42 = vadd.f32 %v4622_v28, %v2461_v53  ;;  %v2916_v4 = vunpack.c.l.bf16 %v2937_v21  ;;  %v2913_v53 = vunpack.c.h.bf16 %v2936_v22 }
 0x42b   : > { %v2575_v34 = vmax.f32 %v2547_v39, 0.0  ;;  %v2548_v58 = vadd.f32 %v2893_v7, %v2470_v31  ;;  %v2912_v7 = vunpack.c.l.bf16 %v2936_v22 }
 0x42c   : > { %v2573_v50 = vmax.f32 %v2545_v6, 0.0  ;;  %v2546_v23 = vadd.f32 %v2889_v56, %v2462_v42  ;;  %v2917_v56 = vunpack.c.h.bf16 %v2937_v21 }
 0x42d   : > { %2603 = vst [vmem:[%s4630_s16 + $0x4f] sm:$0xfe] %v2575_v34  ;;  %v2576_v1 = vmax.f32 %v2548_v58, 0.0 }
 0x42e   : > { %2601 = vst [vmem:[%s4630_s16 + $0x3f] sm:$0xfe] %v2573_v50  ;;  %v2574_v19 = vmax.f32 %v2546_v23, 0.0  ;;  %v3530_v8 = vpop.f32.mrb[140].mxu1 }
 0x42f   : > { %2604 = vst [vmem:[%s4630_s16 + $0x57] sm:$0x7f] %v2576_v1  ;;  %v2483_v29 = vadd.f32 %v3530_v8, %v4622_v28  ;;  %v2474_v36 = vpop.f32.mrb[141].mxu1  ;;  %v2938_v1 = vld [vmem:[%s4132_s23 + $0x68] sm:$0xff]  }
 0x430   : > { %2602 = vst [vmem:[%s4630_s16 + $0x47] sm:$0x7f] %v2574_v19  ;;  %v2475_v59 = vadd.f32 %v4622_v28, %v2474_v36  ;;  %v3531_v44 = vpop.f32.mrb[142].mxu1 }
 0x431   : > { %v2551_v57 = vadd.f32 %v2900_v60, %v2483_v29  ;;  %v2486_v33 = vadd.f32 %v3531_v44, %v4622_v28  ;;  %v2477_v45 = vpop.f32.mrb[143].mxu1 }
 0x432   : > { %v2549_v49 = vadd.f32 %v2896_v46, %v2475_v59  ;;  %v2478_v3 = vadd.f32 %v4622_v28, %v2477_v45  ;;  %v2924_v46 = vunpack.c.l.bf16 %v2939_v55  ;;  %v2921_v45 = vunpack.c.h.bf16 %v2938_v1 }
 0x433   : > { %v2579_v18 = vmax.f32 %v2551_v57, 0.0  ;;  %v2552_v14 = vadd.f32 %v2901_v41, %v2486_v33  ;;  %v2920_v41 = vunpack.c.l.bf16 %v2938_v1 }
 0x434   : > { %v2577_v13 = vmax.f32 %v2549_v49, 0.0  ;;  %v2550_v35 = vadd.f32 %v2897_v48, %v2478_v3  ;;  %v2925_v48 = vunpack.c.h.bf16 %v2939_v55 }
 0x435   : > { %2607 = vst [vmem:[%s4630_s16 + $0x6f] sm:$0xfe] %v2579_v18  ;;  %v2580_v30 = vmax.f32 %v2552_v14, 0.0 }
 0x436   : > { %2605 = vst [vmem:[%s4630_s16 + $0x5f] sm:$0xfe] %v2577_v13  ;;  %v2578_v27 = vmax.f32 %v2550_v35, 0.0  ;;  %v3534_v16 = vpop.f32.mrb[144].mxu1 }
 0x437   : > { %2608 = vst [vmem:[%s4630_s16 + $0x77] sm:$0x7f] %v2580_v30  ;;  %v2499_v15 = vadd.f32 %v3534_v16, %v4622_v28  ;;  %v2490_v43 = vpop.f32.mrb[145].mxu1 }
 0x438   : > { %2606 = vst [vmem:[%s4630_s16 + $0x67] sm:$0x7f] %v2578_v27  ;;  %v2491_v9 = vadd.f32 %v4622_v28, %v2490_v43  ;;  %v3535_v0 = vpop.f32.mrb[146].mxu1 }
 0x439   : > { %v2555_v5 = vadd.f32 %v2908_v17, %v2499_v15  ;;  %v2502_v40 = vadd.f32 %v3535_v0, %v4622_v28  ;;  %v2493_v37 = vpop.f32.mrb[147].mxu1 }
 0x43a   : > { %v2553_v61 = vadd.f32 %v2904_v26, %v2491_v9  ;;  %v2494_v38 = vadd.f32 %v4622_v28, %v2493_v37 }
 0x43b   : > { %v2583_v11 = vmax.f32 %v2555_v5, 0.0  ;;  %v2556_v24 = vadd.f32 %v2909_v12, %v2502_v40 }
 0x43c   : > { %v2581_v32 = vmax.f32 %v2553_v61, 0.0  ;;  %v2554_v10 = vadd.f32 %v2905_v62, %v2494_v38 }
 0x43d   : > { %2611 = vst [vmem:[%s4630_s16 + $0x8f] sm:$0xfe] %v2583_v11  ;;  %v2584_v63 = vmax.f32 %v2556_v24, 0.0 }
 0x43e   : > { %2609 = vst [vmem:[%s4630_s16 + $0x7f] sm:$0xfe] %v2581_v32  ;;  %v2582_v25 = vmax.f32 %v2554_v10, 0.0  ;;  %v3538_v52 = vpop.f32.mrb[148].mxu1 }
 0x43f   : > { %2612 = vst [vmem:[%s4630_s16 + $0x97] sm:$0x7f] %v2584_v63  ;;  %v2515_v54 = vadd.f32 %v3538_v52, %v4622_v28  ;;  %v2506_v20 = vpop.f32.mrb[149].mxu1 }
 0x440   : > { %2610 = vst [vmem:[%s4630_s16 + $0x87] sm:$0x7f] %v2582_v25  ;;  %v2507_v39 = vadd.f32 %v4622_v28, %v2506_v20  ;;  %v3539_v31 = vpop.f32.mrb[150].mxu1 }
 0x441   : > { %v2559_v6 = vadd.f32 %v2916_v4, %v2515_v54  ;;  %v2518_v42 = vadd.f32 %v3539_v31, %v4622_v28  ;;  %v2509_v2 = vpop.f32.mrb[151].mxu1 }
 0x442   : > { %v2557_v34 = vadd.f32 %v2912_v7, %v2507_v39  ;;  %v2510_v58 = vadd.f32 %v4622_v28, %v2509_v2 }
 0x443   : > { %v2587_v50 = vmax.f32 %v2559_v6, 0.0  ;;  %v2560_v23 = vadd.f32 %v2917_v56, %v2518_v42 }
 0x444   : > { %v2585_v60 = vmax.f32 %v2557_v34, 0.0  ;;  %v2558_v19 = vadd.f32 %v2913_v53, %v2510_v58 }
 0x445   : > { %2615 = vst [vmem:[%s4630_s16 + $0xaf] sm:$0xfe] %v2587_v50  ;;  %v2588_v8 = vmax.f32 %v2560_v23, 0.0 }
 0x446   : > { %2613 = vst [vmem:[%s4630_s16 + $0x9f] sm:$0xfe] %v2585_v60  ;;  %v2586_v29 = vmax.f32 %v2558_v19, 0.0  ;;  %v3542_v36 = vpop.f32.mrb[152].mxu1 }
 0x447   : > { %2616 = vst [vmem:[%s4630_s16 + $0xb7] sm:$0x7f] %v2588_v8  ;;  %v2531_v59 = vadd.f32 %v3542_v36, %v4622_v28  ;;  %v2522_v44 = vpop.f32.mrb[153].mxu1 }
 0x448   : > { %2614 = vst [vmem:[%s4630_s16 + $0xa7] sm:$0x7f] %v2586_v29  ;;  %v2523_v57 = vadd.f32 %v4622_v28, %v2522_v44  ;;  %v3543_v33 = vpop.f32.mrb[154].mxu1 }
 0x449   : > { %v2563_v49 = vadd.f32 %v2924_v46, %v2531_v59  ;;  %v2534_v3 = vadd.f32 %v3543_v33, %v4622_v28  ;;  %v2525_v51 = vpop.f32.mrb[155].mxu1 }
 0x44a   : > { %v2561_v18 = vadd.f32 %v2920_v41, %v2523_v57  ;;  %v2526_v14 = vadd.f32 %v4622_v28, %v2525_v51 }
 0x44b   : > { %v2591_v47 = vmax.f32 %v2563_v49, 0.0  ;;  %v2564_v13 = vadd.f32 %v2925_v48, %v2534_v3 }
 0x44c   : > { %v2589_v35 = vmax.f32 %v2561_v18, 0.0  ;;  %v2562_v30 = vadd.f32 %v2921_v45, %v2526_v14 }
 0x44d   : > { %2619 = vst [vmem:[%s4630_s16 + $0xcf] sm:$0xfe] %v2591_v47  ;;  %v2592_v17 = vmax.f32 %v2564_v13, 0.0 }
 0x44e   : > { %2617 = vst [vmem:[%s4630_s16 + $0xbf] sm:$0xfe] %v2589_v35  ;;  %v2590_v27 = vmax.f32 %v2562_v30, 0.0 }
 0x44f   : > { %2620 = vst [vmem:[%s4630_s16 + $0xd7] sm:$0x7f] %v2592_v17 }
 0x450   : > { %2618 = vst [vmem:[%s4630_s16 + $0xc7] sm:$0x7f] %v2590_v27 }
 0x451 PF: > { %p19_p9 = scmp.ge.s32.totalorder %s4073_s20, 4   ;;  %s4732_s24 = smov %s3886_s25 }
 0x452   : > { %s4733_s25 = smov %s3890_s26  ;;  %s4734_s26 = smov %s4083_s11 }
 0x453   : > { %s4735_s27 = smov %s4073_s20  ;;  %21 = sbr.rel (!%p19_p9) target bundleno = 5 (0x5), region = 101 }
 0x45a   :  { %2642 = vsyncpa [#allocation4], 1 }
 0x45b   :  { %2644 = vsyncpa [#allocation4 + $0x1], 1 }
 0x45c   :  { %2645 = vsyncpa [#allocation6], 1 }
 0x45d   :  { %2646 = vsyncpa [#allocation9], 1 }

</bundles_post_ra>
